<compile_context>
chip_gen: v5e
topology: v5e:2x2
jax: 0.10.0
libtpu: 0.0.40
codegen_flags: <defaults>
</compile_context>

<pallas_src>
import jax
import jax.numpy as jnp
from jax.experimental import pallas as pl
from jax.experimental.pallas import tpu as pltpu

# ---------------- configuration (small synthetic sizes) ----------------
N_BATCH  = 2
T_IN     = 16          # feature frames per streaming chunk (pre subsample-by-2)
C_FEAT   = 16          # input feature dim
CH       = 4           # ConvNeXt channels in encoder_embed cache
NFREQ    = 8           # num_freqs in the ConvNeXt cache
LEFT_PAD = 4           # cached left-pad frames for ConvNeXt
K_CONV   = LEFT_PAD + 1
CHUNK    = 8           # encoder.chunk_size[0]  (= T_IN // 2)
LEFT_CTX = 16          # encoder.left_context_frames[0]
D_MODEL  = 32
N_HEADS  = 4
HEAD_DIM = D_MODEL // N_HEADS
D_FF     = 64
N_LAYERS = 2
NEG_INF  = -1e9
CF       = CH * NFREQ              # flattened channel*freq lane axis
TKV      = LEFT_CTX + CHUNK        # total key/value length per layer
EMB_PAD0 = 8 - LEFT_PAD            # sublane-align the new-frame writes
XP_LEN   = EMB_PAD0 + LEFT_PAD + T_IN

N_EMBED_W = 5
N_LAYER_W = 8
N_IN  = 3 + 2 * N_LAYERS + N_EMBED_W + N_LAYER_W   # pallas_call inputs
N_OUT = 2 + 2 * N_LAYERS                           # pallas_call outputs


# ======================= fused Pallas kernel =======================

def _fused_forward_kernel(*args):
    """encoder_embed.streaming_forward + N_LAYERS encoder layers, fully fused.

    Inputs : feat (N,T_in,C), embed cache (N,LP,CF), key-pad bias (N,TKV),
             per-layer cached_key/cached_val (N,LEFT_CTX,D) x 2*N_LAYERS,
             embed weights (5), stacked per-layer weights (8).
    Outputs: encoder_out (N,CHUNK,D), new embed cache (N,LP,CF),
             new cached_key/cached_val per layer (aliased in-place).
    """
    in_refs = args[:N_IN]
    out_refs = args[N_IN:N_IN + N_OUT]
    xp_s, k_s, v_s, attn_s = args[N_IN + N_OUT:]

    feat_ref, ecache_ref, bias_ref = in_refs[:3]
    kv_cache_refs = in_refs[3:3 + 2 * N_LAYERS]
    (w_in_ref, b_in_ref, conv_w_ref, w_out_ref, b_out_ref,
     wqkv_ref, bqkv_ref, wo_ref, bo_ref,
     w1_ref, b1_ref, w2_ref, b2_ref) = in_refs[3 + 2 * N_LAYERS:]
    out_ref, new_ecache_ref = out_refs[:2]
    new_kv_refs = out_refs[2:]

    n, t_in, c_in = feat_ref.shape
    lp = ecache_ref.shape[1]
    cf = ecache_ref.shape[2]
    t = out_ref.shape[1]                       # chunk size after subsample-by-2
    d = out_ref.shape[2]
    pad0 = xp_s.shape[1] - (lp + t_in)         # alignment padding rows (unused)
    tkv = k_s.shape[1]
    lctx = tkv - t
    nh, hd = N_HEADS, d // N_HEADS

    # ---------------- encoder_embed (fused) ----------------
    # input projection: (N*T_in, C) @ (C, CH*F)   [bf16 weights, f32 accumulate]
    h = jnp.dot(feat_ref[...].reshape(n * t_in, c_in).astype(jnp.bfloat16),
                w_in_ref[...], preferred_element_type=jnp.float32) + b_in_ref[...]

    # cached left pad + new frames assembled in VMEM scratch; the large
    # new-frame store starts at sublane offset pad0 + lp == 8 (aligned).
    xp_s[:, pad0:pad0 + lp, :] = ecache_ref[...]
    xp_s[:, pad0 + lp:, :] = h.reshape(n, t_in, cf)

    # updated streaming embed cache = last `lp` frames
    new_ecache_ref[...] = xp_s[:, pad0 + t_in:, :]

    # depthwise causal conv (per-channel taps broadcast over freq) evaluated
    # only at subsample-by-2 output positions t0 = 2j+1 — vectorized as
    # K_CONV strided-slice (stride-2) MACs over the whole (N, CHUNK, CF) block.
    cw = conv_w_ref[...]                                   # (K, CF) f32
    acc = xp_s[:, pl.ds(pad0 + 1, t, stride=2), :] * cw[0:1, :].reshape(1, 1, cf)
    for kk in range(1, K_CONV):
        acc = acc + (xp_s[:, pl.ds(pad0 + 1 + kk, t, stride=2), :]
                     * cw[kk:kk + 1, :].reshape(1, 1, cf))
    sub = jnp.maximum(acc, 0.0)                            # ReLU, (N, CHUNK, CF)

    # output projection to d_model; keep x as a 2-D (N*T, D) slab from here on
    x2d = jnp.dot(sub.reshape(n * t, cf).astype(jnp.bfloat16), w_out_ref[...],
                  preferred_element_type=jnp.float32) + b_out_ref[...]

    # ---------------- encoder layers (unrolled, VMEM-resident) ----------------
    bias3 = bias_ref[...].reshape(n, 1, tkv)               # hoisted key-pad bias
    scale = 1.0 / (hd ** 0.5)

    for li in range(N_LAYERS):
        # fused Q/K/V projection: one (D, 3D) matmul; softmax scale folded into q
        qkv = jnp.dot(x2d.astype(jnp.bfloat16), wqkv_ref[li],
                      preferred_element_type=jnp.float32) + bqkv_ref[li]
        q = qkv[:, 0:d] * scale
        k_new = qkv[:, d:2 * d]
        v_new = qkv[:, 2 * d:3 * d]

        # assemble full K/V (cache + new) in VMEM scratch (no XLA concat)
        ck_ref = kv_cache_refs[2 * li]
        cv_ref = kv_cache_refs[2 * li + 1]
        k_s[:, :lctx, :] = ck_ref[...]
        k_s[:, lctx:, :] = k_new.reshape(n, t, d)
        v_s[:, :lctx, :] = cv_ref[...]
        v_s[:, lctx:, :] = v_new.reshape(n, t, d)

        # streaming cache update: keep the last `lctx` frames (aliased in HBM)
        new_kv_refs[2 * li][...] = k_s[:, t:, :]
        new_kv_refs[2 * li + 1][...] = v_s[:, t:, :]

        k_full = k_s[...]                                   # (N, TKV, D)
        v_full = v_s[...]

        # per-head score / softmax / PV (single-batch-dim 3-D einsums); heads
        # assembled in VMEM, then ONE (N*T, D) @ (D, D) output projection.
        for hi in range(nh):
            c0 = hi * hd
            qh = q[:, c0:c0 + hd].reshape(n, t, hd)
            kh = k_full[:, :, c0:c0 + hd]
            vh = v_full[:, :, c0:c0 + hd]
            s = jnp.einsum('bqd,bkd->bqk', qh, kh,
                           preferred_element_type=jnp.float32) + bias3
            m = jnp.max(s, axis=-1, keepdims=True)
            p = jnp.exp(s - m)
            l = jnp.sum(p, axis=-1, keepdims=True)
            o = jnp.einsum('bqk,bkd->bqd', p, vh,
                           preferred_element_type=jnp.float32)
            attn_s[:, :, c0:c0 + hd] = o * pl.reciprocal(l, approx=True)

        attn = attn_s[...].reshape(n * t, d)
        x2d = x2d + jnp.dot(attn.astype(jnp.bfloat16), wo_ref[li],
                            preferred_element_type=jnp.float32) + bo_ref[li]

        # fused feed-forward: w1 + ReLU + w2 (D_FF intermediate stays in VMEM)
        ff = jnp.maximum(
            jnp.dot(x2d.astype(jnp.bfloat16), w1_ref[li],
                    preferred_element_type=jnp.float32) + b1_ref[li], 0.0)
        x2d = x2d + jnp.dot(ff.astype(jnp.bfloat16), w2_ref[li],
                            preferred_element_type=jnp.float32) + b2_ref[li]

    out_ref[...] = x2d.reshape(n, t, d)


# ======================= parameter init (deterministic) =======================

def init_params(key):
    ks = list(jax.random.split(key, 4 + N_LAYERS * 6))

    def nrm(k, shape, scale, dtype=jnp.float32):
        return (jax.random.normal(k, shape, jnp.float32) * scale).astype(dtype)

    conv_w = nrm(ks[1], (CH, K_CONV), 0.2)
    p = {
        # matmul weights stored bf16 (MXU inputs); biases / conv taps stay f32
        "embed_w_in":  nrm(ks[0], (C_FEAT, CF), 0.1, jnp.bfloat16),
        "embed_b_in":  jnp.zeros((1, CF), jnp.float32),
        # per-channel taps expanded across freq so the conv runs lane-dense
        # on the flattened CH*NFREQ axis:
        "embed_conv_w_exp": jnp.repeat(conv_w.T, NFREQ, axis=1),   # (K, CF)
        "embed_w_out": nrm(ks[2], (CF, D_MODEL), 0.1, jnp.bfloat16),
        "embed_b_out": jnp.zeros((1, D_MODEL), jnp.float32),
    }
    wqkv, wo, w1, w2 = [], [], [], []
    for i in range(N_LAYERS):
        b = 4 + i * 6
        wqkv.append(jnp.concatenate(
            [nrm(ks[b + 0], (D_MODEL, D_MODEL), 0.08),
             nrm(ks[b + 1], (D_MODEL, D_MODEL), 0.08),
             nrm(ks[b + 2], (D_MODEL, D_MODEL), 0.08)], axis=1))    # (D, 3D)
        wo.append(nrm(ks[b + 3], (D_MODEL, D_MODEL), 0.08))
        w1.append(nrm(ks[b + 4], (D_MODEL, D_FF), 0.08))
        w2.append(nrm(ks[b + 5], (D_FF, D_MODEL), 0.08))
    p["wqkv"] = jnp.stack(wqkv).astype(jnp.bfloat16)
    p["bqkv"] = jnp.zeros((N_LAYERS, 1, 3 * D_MODEL), jnp.float32)
    p["wo"]   = jnp.stack(wo).astype(jnp.bfloat16)
    p["bo"]   = jnp.zeros((N_LAYERS, 1, D_MODEL), jnp.float32)
    p["w1"]   = jnp.stack(w1).astype(jnp.bfloat16)
    p["b1"]   = jnp.zeros((N_LAYERS, 1, D_FF), jnp.float32)
    p["w2"]   = jnp.stack(w2).astype(jnp.bfloat16)
    p["b2"]   = jnp.zeros((N_LAYERS, 1, D_MODEL), jnp.float32)
    return p


def get_init_states(batch_size):
    """Per-layer caches, then states[-2] = cached embed left pad
    (N, CH, left_pad, num_freqs), states[-1] = processed_lens (N,) int32.

    The synthetic encoder stores its per-layer KV caches batch-first
    (N, LEFT_CTX, D) so they can be aliased in-place by the fused kernel.
    # TODO(synk): real Zipformer keeps 6 cached tensors/layer (key, nonlin_attn,
    # val1, val2, conv1, conv2) in (LEFT_CTX, N, ...) layout; this synthetic
    # encoder caches key/val only.
    """
    states = []
    for _ in range(N_LAYERS):
        states.append(jnp.zeros((batch_size, LEFT_CTX, D_MODEL), jnp.float32))  # cached_key
        states.append(jnp.zeros((batch_size, LEFT_CTX, D_MODEL), jnp.float32))  # cached_val
    states.append(jnp.zeros((batch_size, CH, LEFT_PAD, NFREQ), jnp.float32))    # embed left pad
    states.append(jnp.zeros((batch_size,), jnp.int32))                          # processed_lens
    return states


# ======================= model forward =======================

def make_pad_mask(lengths, max_len):
    return jnp.arange(max_len, dtype=jnp.int32)[None, :] >= lengths[:, None]


def streaming_encoder_forward(features, feature_lengths, states, params):
    """Mirrors StreamingEncoderModel.forward; all tensor math in ONE pallas_call."""
    chunk_size = CHUNK
    left_context_len = LEFT_CTX
    assert chunk_size == T_IN // 2, (chunk_size, T_IN)
    n = features.shape[0]

    # --- encoder_embed state: (N, CH, LP, F) -> lane-dense (N, LP, CH*F) ---
    cached_embed_left_pad = states[-2]
    cache_flat = cached_embed_left_pad.transpose(0, 2, 1, 3).reshape(n, LEFT_PAD, CF)

    # embed subsample-by-2 length update (the embed itself runs in-kernel)
    x_lens = (feature_lengths // 2).astype(jnp.int32)

    # --- mask / processed_lens bookkeeping (identical to the PyTorch wrapper) ---
    src_key_padding_mask = make_pad_mask(x_lens, chunk_size)            # (N, chunk)
    processed_mask = jnp.arange(left_context_len, dtype=jnp.int32)[None, :]
    processed_mask = jnp.broadcast_to(processed_mask, (n, left_context_len))
    processed_lens = states[-1]
    processed_mask = (processed_lens[:, None] <= processed_mask)[:, ::-1]
    new_processed_lens = processed_lens + x_lens
    src_key_padding_mask = jnp.concatenate(
        [processed_mask, src_key_padding_mask], axis=1)                 # (N, TKV)
    bias = jnp.where(src_key_padding_mask, NEG_INF, 0.0).astype(jnp.float32)

    # per-layer caches, batch-first, passed un-stacked and aliased in-place
    encoder_states = list(states[:-2])
    p = params

    out_shape = (
        jax.ShapeDtypeStruct((n, CHUNK, D_MODEL), jnp.float32),
        jax.ShapeDtypeStruct((n, LEFT_PAD, CF), jnp.float32),
    ) + tuple(jax.ShapeDtypeStruct((n, LEFT_CTX, D_MODEL), jnp.float32)
              for _ in range(2 * N_LAYERS))

    outs = pl.pallas_call(
        _fused_forward_kernel,
        out_shape=out_shape,
        scratch_shapes=[
            pltpu.VMEM((n, XP_LEN, CF), jnp.float32),      # embed left-pad + frames
            pltpu.VMEM((n, TKV, D_MODEL), jnp.float32),    # full K per layer
            pltpu.VMEM((n, TKV, D_MODEL), jnp.float32),    # full V per layer
            pltpu.VMEM((n, CHUNK, D_MODEL), jnp.float32),  # per-head attn assembly
        ],
        # alias each cached_key / cached_val input onto its updated output
        input_output_aliases={3 + j: 2 + j for j in range(2 * N_LAYERS)},
    )(features, cache_flat, bias, *encoder_states,
      p["embed_w_in"], p["embed_b_in"], p["embed_conv_w_exp"],
      p["embed_w_out"], p["embed_b_out"],
      p["wqkv"], p["bqkv"], p["wo"], p["bo"],
      p["w1"], p["b1"], p["w2"], p["b2"])

    encoder_out = outs[0]
    new_cache_flat = outs[1]
    new_encoder_states = list(outs[2:])

    new_cached_embed_left_pad = new_cache_flat.reshape(
        n, LEFT_PAD, CH, NFREQ).transpose(0, 2, 1, 3)
    encoder_out_lens = x_lens

    new_states = new_encoder_states + [new_cached_embed_left_pad, new_processed_lens]
    return encoder_out, encoder_out_lens, new_states


# ======================= main =======================

if __name__ == "__main__":
    key = jax.random.PRNGKey(0)
    k_param, k_feat = jax.random.split(key)

    params = init_params(k_param)
    features = jax.random.normal(k_feat, (N_BATCH, T_IN, C_FEAT), jnp.float32)
    feature_lengths = jnp.array([16, 12], dtype=jnp.int32)
    states = get_init_states(N_BATCH)

    forward = jax.jit(streaming_encoder_forward)
    encoder_out, encoder_out_lens, new_states = forward(
        features, feature_lengths, states, params)

    jax.block_until_ready((encoder_out, encoder_out_lens, new_states))

    assert encoder_out.shape == (N_BATCH, CHUNK, D_MODEL)
    assert encoder_out_lens.shape == (N_BATCH,)
    assert len(new_states) == 2 * N_LAYERS + 2
    assert new_states[0].shape == (N_BATCH, LEFT_CTX, D_MODEL)
    assert new_states[-2].shape == (N_BATCH, CH, LEFT_PAD, NFREQ)
    assert new_states[-1].shape == (N_BATCH,)
    assert bool(jnp.all(jnp.isfinite(encoder_out)))
    print("KERNEL_OK")
</pallas_src>

<mosaic_0001>
module attributes {stable_mosaic.version = 11 : i64} {
  func.func @_fused_forward_kernel(%arg0: memref<2x16x16xf32, #tpu.memory_space<vmem>>, %arg1: memref<2x4x32xf32, #tpu.memory_space<vmem>>, %arg2: memref<2x24xf32, #tpu.memory_space<vmem>>, %arg3: memref<2x16x32xf32, #tpu.memory_space<vmem>>, %arg4: memref<2x16x32xf32, #tpu.memory_space<vmem>>, %arg5: memref<2x16x32xf32, #tpu.memory_space<vmem>>, %arg6: memref<2x16x32xf32, #tpu.memory_space<vmem>>, %arg7: memref<16x32xbf16, #tpu.memory_space<vmem>>, %arg8: memref<1x32xf32, #tpu.memory_space<vmem>>, %arg9: memref<5x32xf32, #tpu.memory_space<vmem>>, %arg10: memref<32x32xbf16, #tpu.memory_space<vmem>>, %arg11: memref<1x32xf32, #tpu.memory_space<vmem>>, %arg12: memref<2x32x96xbf16, #tpu.memory_space<vmem>>, %arg13: memref<2x1x96xf32, #tpu.memory_space<vmem>>, %arg14: memref<2x32x32xbf16, #tpu.memory_space<vmem>>, %arg15: memref<2x1x32xf32, #tpu.memory_space<vmem>>, %arg16: memref<2x32x64xbf16, #tpu.memory_space<vmem>>, %arg17: memref<2x1x64xf32, #tpu.memory_space<vmem>>, %arg18: memref<2x64x32xbf16, #tpu.memory_space<vmem>>, %arg19: memref<2x1x32xf32, #tpu.memory_space<vmem>>, %arg20: memref<2x8x32xf32, #tpu.memory_space<vmem>>, %arg21: memref<2x4x32xf32, #tpu.memory_space<vmem>>, %arg22: memref<2x16x32xf32, #tpu.memory_space<vmem>>, %arg23: memref<2x16x32xf32, #tpu.memory_space<vmem>>, %arg24: memref<2x16x32xf32, #tpu.memory_space<vmem>>, %arg25: memref<2x16x32xf32, #tpu.memory_space<vmem>>, %arg26: memref<2x24x32xf32, #tpu.memory_space<vmem>>, %arg27: memref<2x24x32xf32, #tpu.memory_space<vmem>>, %arg28: memref<2x24x32xf32, #tpu.memory_space<vmem>>, %arg29: memref<2x8x32xf32, #tpu.memory_space<vmem>>) attributes {dimension_semantics = [], scalar_prefetch = 0 : i64, scratch_operands = 4 : i64, tpu.core_type = #tpu.core_type<tc>} {
    %c0 = arith.constant 0 : index
    %c0_0 = arith.constant 0 : index
    %c0_1 = arith.constant 0 : index
    %0 = vector.load %arg0[%c0, %c0_0, %c0_1] : memref<2x16x16xf32, #tpu.memory_space<vmem>>, vector<2x16x16xf32>
    %1 = vector.shape_cast %0 : vector<2x16x16xf32> to vector<32x16xf32>
    %2 = arith.truncf %1 : vector<32x16xf32> to vector<32x16xbf16>
    %c0_2 = arith.constant 0 : index
    %c0_3 = arith.constant 0 : index
    %3 = vector.load %arg7[%c0_2, %c0_3] : memref<16x32xbf16, #tpu.memory_space<vmem>>, vector<16x32xbf16>
    %cst = arith.constant dense<0.000000e+00> : vector<32x32xf32>
    %4 = tpu.matmul %2, %3, %cst {dimension_numbers = #tpu.dot_dimension_numbers<[1], [0], [0], [1], [0, 0, 1, 1], [], []>} : vector<32x16xbf16>, vector<16x32xbf16>, vector<32x32xf32> -> vector<32x32xf32>
    %c0_4 = arith.constant 0 : index
    %c0_5 = arith.constant 0 : index
    %5 = vector.load %arg8[%c0_4, %c0_5] : memref<1x32xf32, #tpu.memory_space<vmem>>, vector<1x32xf32>
    %6 = vector.broadcast %5 : vector<1x32xf32> to vector<32x32xf32>
    %7 = arith.addf %4, %6 : vector<32x32xf32>
    %c0_6 = arith.constant 0 : index
    %c0_7 = arith.constant 0 : index
    %c0_8 = arith.constant 0 : index
    %8 = vector.load %arg1[%c0_6, %c0_7, %c0_8] : memref<2x4x32xf32, #tpu.memory_space<vmem>>, vector<2x4x32xf32>
    %c0_9 = arith.constant 0 : index
    %c4 = arith.constant 4 : index
    %c0_10 = arith.constant 0 : index
    %9 = vector.load %arg26[%c0_9, %c4, %c0_10] : memref<2x24x32xf32, #tpu.memory_space<vmem>>, vector<2x4x32xf32>
    tpu.vector_store %arg26[%c0_9, %c4, %c0_10], %8 {strides = array<i32>} : memref<2x24x32xf32, #tpu.memory_space<vmem>>, vector<2x4x32xf32>,
    %10 = vector.shape_cast %7 : vector<32x32xf32> to vector<2x16x32xf32>
    %c0_11 = arith.constant 0 : index
    %c8 = arith.constant 8 : index
    %c0_12 = arith.constant 0 : index
    %11 = vector.load %arg26[%c0_11, %c8, %c0_12] : memref<2x24x32xf32, #tpu.memory_space<vmem>>, vector<2x16x32xf32>
    tpu.vector_store %arg26[%c0_11, %c8, %c0_12], %10 {strides = array<i32>} : memref<2x24x32xf32, #tpu.memory_space<vmem>>, vector<2x16x32xf32>,
    %c0_13 = arith.constant 0 : index
    %c20 = arith.constant 20 : index
    %c0_14 = arith.constant 0 : index
    %12 = vector.load %arg26[%c0_13, %c20, %c0_14] : memref<2x24x32xf32, #tpu.memory_space<vmem>>, vector<2x4x32xf32>
    %c0_15 = arith.constant 0 : index
    %c0_16 = arith.constant 0 : index
    %c0_17 = arith.constant 0 : index
    %13 = vector.load %arg21[%c0_15, %c0_16, %c0_17] : memref<2x4x32xf32, #tpu.memory_space<vmem>>, vector<2x4x32xf32>
    tpu.vector_store %arg21[%c0_15, %c0_16, %c0_17], %12 {strides = array<i32>} : memref<2x4x32xf32, #tpu.memory_space<vmem>>, vector<2x4x32xf32>,
    %c0_18 = arith.constant 0 : index
    %c0_19 = arith.constant 0 : index
    %14 = vector.load %arg9[%c0_18, %c0_19] : memref<5x32xf32, #tpu.memory_space<vmem>>, vector<5x32xf32>
    %c0_20 = arith.constant 0 : index
    %c5 = arith.constant 5 : index
    %c0_21 = arith.constant 0 : index
    %15 = tpu.strided_load %arg26[%c0_20, %c5, %c0_21] {strides = array<i32: 1, 2, 1>} : memref<2x24x32xf32, #tpu.memory_space<vmem>>, vector<2x8x32xf32>
    %16 = vector.extract_strided_slice %14 {offsets = [0, 0], sizes = [1, 32], strides = [1, 1]} : vector<5x32xf32> to vector<1x32xf32>
    %17 = vector.shape_cast %16 : vector<1x32xf32> to vector<1x1x32xf32>
    %18 = vector.broadcast %17 : vector<1x1x32xf32> to vector<2x8x32xf32>
    %19 = arith.mulf %15, %18 : vector<2x8x32xf32>
    %c0_22 = arith.constant 0 : index
    %c6 = arith.constant 6 : index
    %c0_23 = arith.constant 0 : index
    %20 = tpu.strided_load %arg26[%c0_22, %c6, %c0_23] {strides = array<i32: 1, 2, 1>} : memref<2x24x32xf32, #tpu.memory_space<vmem>>, vector<2x8x32xf32>
    %21 = vector.extract_strided_slice %14 {offsets = [1, 0], sizes = [1, 32], strides = [1, 1]} : vector<5x32xf32> to vector<1x32xf32>
    %22 = vector.shape_cast %21 : vector<1x32xf32> to vector<1x1x32xf32>
    %23 = vector.broadcast %22 : vector<1x1x32xf32> to vector<2x8x32xf32>
    %24 = arith.mulf %20, %23 : vector<2x8x32xf32>
    %25 = arith.addf %19, %24 : vector<2x8x32xf32>
    %c0_24 = arith.constant 0 : index
    %c7 = arith.constant 7 : index
    %c0_25 = arith.constant 0 : index
    %26 = tpu.strided_load %arg26[%c0_24, %c7, %c0_25] {strides = array<i32: 1, 2, 1>} : memref<2x24x32xf32, #tpu.memory_space<vmem>>, vector<2x8x32xf32>
    %27 = vector.extract_strided_slice %14 {offsets = [2, 0], sizes = [1, 32], strides = [1, 1]} : vector<5x32xf32> to vector<1x32xf32>
    %28 = vector.shape_cast %27 : vector<1x32xf32> to vector<1x1x32xf32>
    %29 = vector.broadcast %28 : vector<1x1x32xf32> to vector<2x8x32xf32>
    %30 = arith.mulf %26, %29 : vector<2x8x32xf32>
    %31 = arith.addf %25, %30 : vector<2x8x32xf32>
    %c0_26 = arith.constant 0 : index
    %c8_27 = arith.constant 8 : index
    %c0_28 = arith.constant 0 : index
    %32 = tpu.strided_load %arg26[%c0_26, %c8_27, %c0_28] {strides = array<i32: 1, 2, 1>} : memref<2x24x32xf32, #tpu.memory_space<vmem>>, vector<2x8x32xf32>
    %33 = vector.extract_strided_slice %14 {offsets = [3, 0], sizes = [1, 32], strides = [1, 1]} : vector<5x32xf32> to vector<1x32xf32>
    %34 = vector.shape_cast %33 : vector<1x32xf32> to vector<1x1x32xf32>
    %35 = vector.broadcast %34 : vector<1x1x32xf32> to vector<2x8x32xf32>
    %36 = arith.mulf %32, %35 : vector<2x8x32xf32>
    %37 = arith.addf %31, %36 : vector<2x8x32xf32>
    %c0_29 = arith.constant 0 : index
    %c9 = arith.constant 9 : index
    %c0_30 = arith.constant 0 : index
    %38 = tpu.strided_load %arg26[%c0_29, %c9, %c0_30] {strides = array<i32: 1, 2, 1>} : memref<2x24x32xf32, #tpu.memory_space<vmem>>, vector<2x8x32xf32>
    %39 = vector.extract_strided_slice %14 {offsets = [4, 0], sizes = [1, 32], strides = [1, 1]} : vector<5x32xf32> to vector<1x32xf32>
    %40 = vector.shape_cast %39 : vector<1x32xf32> to vector<1x1x32xf32>
    %41 = vector.broadcast %40 : vector<1x1x32xf32> to vector<2x8x32xf32>
    %42 = arith.mulf %38, %41 : vector<2x8x32xf32>
    %43 = arith.addf %37, %42 : vector<2x8x32xf32>
    %cst_31 = arith.constant 0.000000e+00 : f32
    %44 = vector.broadcast %cst_31 : f32 to vector<2x8x32xf32>
    %45 = arith.maximumf %43, %44 : vector<2x8x32xf32>
    %46 = vector.shape_cast %45 : vector<2x8x32xf32> to vector<16x32xf32>
    %47 = arith.truncf %46 : vector<16x32xf32> to vector<16x32xbf16>
    %c0_32 = arith.constant 0 : index
    %c0_33 = arith.constant 0 : index
    %48 = vector.load %arg10[%c0_32, %c0_33] : memref<32x32xbf16, #tpu.memory_space<vmem>>, vector<32x32xbf16>
    %cst_34 = arith.constant dense<0.000000e+00> : vector<16x32xf32>
    %49 = tpu.matmul %47, %48, %cst_34 {dimension_numbers = #tpu.dot_dimension_numbers<[1], [0], [0], [1], [0, 0, 1, 1], [], []>} : vector<16x32xbf16>, vector<32x32xbf16>, vector<16x32xf32> -> vector<16x32xf32>
    %c0_35 = arith.constant 0 : index
    %c0_36 = arith.constant 0 : index
    %50 = vector.load %arg11[%c0_35, %c0_36] : memref<1x32xf32, #tpu.memory_space<vmem>>, vector<1x32xf32>
    %51 = vector.broadcast %50 : vector<1x32xf32> to vector<16x32xf32>
    %52 = arith.addf %49, %51 : vector<16x32xf32>
    %c0_37 = arith.constant 0 : index
    %c0_38 = arith.constant 0 : index
    %53 = vector.load %arg2[%c0_37, %c0_38] : memref<2x24xf32, #tpu.memory_space<vmem>>, vector<2x24xf32>
    %54 = vector.shape_cast %53 : vector<2x24xf32> to vector<2x1x24xf32>
    %55 = arith.truncf %52 : vector<16x32xf32> to vector<16x32xbf16>
    %c0_39 = arith.constant 0 : index
    %c0_40 = arith.constant 0 : index
    %c0_41 = arith.constant 0 : index
    %56 = vector.load %arg12[%c0_39, %c0_40, %c0_41] : memref<2x32x96xbf16, #tpu.memory_space<vmem>>, vector<1x32x96xbf16>
    %57 = vector.shape_cast %56 : vector<1x32x96xbf16> to vector<32x96xbf16>
    %cst_42 = arith.constant dense<0.000000e+00> : vector<16x96xf32>
    %58 = tpu.matmul %55, %57, %cst_42 {dimension_numbers = #tpu.dot_dimension_numbers<[1], [0], [0], [1], [0, 0, 1, 1], [], []>} : vector<16x32xbf16>, vector<32x96xbf16>, vector<16x96xf32> -> vector<16x96xf32>
    %c0_43 = arith.constant 0 : index
    %c0_44 = arith.constant 0 : index
    %c0_45 = arith.constant 0 : index
    %59 = vector.load %arg13[%c0_43, %c0_44, %c0_45] : memref<2x1x96xf32, #tpu.memory_space<vmem>>, vector<1x1x96xf32>
    %60 = vector.shape_cast %59 : vector<1x1x96xf32> to vector<1x96xf32>
    %61 = vector.broadcast %60 : vector<1x96xf32> to vector<16x96xf32>
    %62 = arith.addf %58, %61 : vector<16x96xf32>
    %63 = vector.extract_strided_slice %62 {offsets = [0, 0], sizes = [16, 32], strides = [1, 1]} : vector<16x96xf32> to vector<16x32xf32>
    %cst_46 = arith.constant 0.353553385 : f32
    %64 = vector.broadcast %cst_46 : f32 to vector<16x32xf32>
    %65 = arith.mulf %63, %64 : vector<16x32xf32>
    %66 = vector.extract_strided_slice %62 {offsets = [0, 32], sizes = [16, 32], strides = [1, 1]} : vector<16x96xf32> to vector<16x32xf32>
    %67 = vector.extract_strided_slice %62 {offsets = [0, 64], sizes = [16, 32], strides = [1, 1]} : vector<16x96xf32> to vector<16x32xf32>
    %c0_47 = arith.constant 0 : index
    %c0_48 = arith.constant 0 : index
    %c0_49 = arith.constant 0 : index
    %68 = vector.load %arg3[%c0_47, %c0_48, %c0_49] : memref<2x16x32xf32, #tpu.memory_space<vmem>>, vector<2x16x32xf32>
    %c0_50 = arith.constant 0 : index
    %c0_51 = arith.constant 0 : index
    %c0_52 = arith.constant 0 : index
    %69 = vector.load %arg27[%c0_50, %c0_51, %c0_52] : memref<2x24x32xf32, #tpu.memory_space<vmem>>, vector<2x16x32xf32>
    tpu.vector_store %arg27[%c0_50, %c0_51, %c0_52], %68 {strides = array<i32>} : memref<2x24x32xf32, #tpu.memory_space<vmem>>, vector<2x16x32xf32>,
    %70 = vector.shape_cast %66 : vector<16x32xf32> to vector<2x8x32xf32>
    %c0_53 = arith.constant 0 : index
    %c16 = arith.constant 16 : index
    %c0_54 = arith.constant 0 : index
    %71 = vector.load %arg27[%c0_53, %c16, %c0_54] : memref<2x24x32xf32, #tpu.memory_space<vmem>>, vector<2x8x32xf32>
    tpu.vector_store %arg27[%c0_53, %c16, %c0_54], %70 {strides = array<i32>} : memref<2x24x32xf32, #tpu.memory_space<vmem>>, vector<2x8x32xf32>,
    %c0_55 = arith.constant 0 : index
    %c0_56 = arith.constant 0 : index
    %c0_57 = arith.constant 0 : index
    %72 = vector.load %arg4[%c0_55, %c0_56, %c0_57] : memref<2x16x32xf32, #tpu.memory_space<vmem>>, vector<2x16x32xf32>
    %c0_58 = arith.constant 0 : index
    %c0_59 = arith.constant 0 : index
    %c0_60 = arith.constant 0 : index
    %73 = vector.load %arg28[%c0_58, %c0_59, %c0_60] : memref<2x24x32xf32, #tpu.memory_space<vmem>>, vector<2x16x32xf32>
    tpu.vector_store %arg28[%c0_58, %c0_59, %c0_60], %72 {strides = array<i32>} : memref<2x24x32xf32, #tpu.memory_space<vmem>>, vector<2x16x32xf32>,
    %74 = vector.shape_cast %67 : vector<16x32xf32> to vector<2x8x32xf32>
    %c0_61 = arith.constant 0 : index
    %c16_62 = arith.constant 16 : index
    %c0_63 = arith.constant 0 : index
    %75 = vector.load %arg28[%c0_61, %c16_62, %c0_63] : memref<2x24x32xf32, #tpu.memory_space<vmem>>, vector<2x8x32xf32>
    tpu.vector_store %arg28[%c0_61, %c16_62, %c0_63], %74 {strides = array<i32>} : memref<2x24x32xf32, #tpu.memory_space<vmem>>, vector<2x8x32xf32>,
    %c0_64 = arith.constant 0 : index
    %c8_65 = arith.constant 8 : index
    %c0_66 = arith.constant 0 : index
    %76 = vector.load %arg27[%c0_64, %c8_65, %c0_66] : memref<2x24x32xf32, #tpu.memory_space<vmem>>, vector<2x16x32xf32>
    %c0_67 = arith.constant 0 : index
    %c0_68 = arith.constant 0 : index
    %c0_69 = arith.constant 0 : index
    %77 = vector.load %arg22[%c0_67, %c0_68, %c0_69] : memref<2x16x32xf32, #tpu.memory_space<vmem>>, vector<2x16x32xf32>
    tpu.vector_store %arg22[%c0_67, %c0_68, %c0_69], %76 {strides = array<i32>} : memref<2x16x32xf32, #tpu.memory_space<vmem>>, vector<2x16x32xf32>,
    %c0_70 = arith.constant 0 : index
    %c8_71 = arith.constant 8 : index
    %c0_72 = arith.constant 0 : index
    %78 = vector.load %arg28[%c0_70, %c8_71, %c0_72] : memref<2x24x32xf32, #tpu.memory_space<vmem>>, vector<2x16x32xf32>
    %c0_73 = arith.constant 0 : index
    %c0_74 = arith.constant 0 : index
    %c0_75 = arith.constant 0 : index
    %79 = vector.load %arg23[%c0_73, %c0_74, %c0_75] : memref<2x16x32xf32, #tpu.memory_space<vmem>>, vector<2x16x32xf32>
    tpu.vector_store %arg23[%c0_73, %c0_74, %c0_75], %78 {strides = array<i32>} : memref<2x16x32xf32, #tpu.memory_space<vmem>>, vector<2x16x32xf32>,
    %c0_76 = arith.constant 0 : index
    %c0_77 = arith.constant 0 : index
    %c0_78 = arith.constant 0 : index
    %80 = vector.load %arg27[%c0_76, %c0_77, %c0_78] : memref<2x24x32xf32, #tpu.memory_space<vmem>>, vector<2x24x32xf32>
    %c0_79 = arith.constant 0 : index
    %c0_80 = arith.constant 0 : index
    %c0_81 = arith.constant 0 : index
    %81 = vector.load %arg28[%c0_79, %c0_80, %c0_81] : memref<2x24x32xf32, #tpu.memory_space<vmem>>, vector<2x24x32xf32>
    %82 = vector.extract_strided_slice %65 {offsets = [0, 0], sizes = [16, 8], strides = [1, 1]} : vector<16x32xf32> to vector<16x8xf32>
    %83 = vector.shape_cast %82 : vector<16x8xf32> to vector<2x8x8xf32>
    %84 = vector.extract_strided_slice %80 {offsets = [0, 0, 0], sizes = [2, 24, 8], strides = [1, 1, 1]} : vector<2x24x32xf32> to vector<2x24x8xf32>
    %85 = vector.extract_strided_slice %81 {offsets = [0, 0, 0], sizes = [2, 24, 8], strides = [1, 1, 1]} : vector<2x24x32xf32> to vector<2x24x8xf32>
    "tpu.trace_start"() <{level = 10 : i32, message = "bqd,bkd->bqk"}> : () -> ()
    %cst_82 = arith.constant dense<0.000000e+00> : vector<2x8x24xf32>
    %86 = tpu.matmul %83, %84, %cst_82 {dimension_numbers = #tpu.dot_dimension_numbers<[2], [2], [1], [1], [0, 0, 0, 1, 1, 1], [0], [0]>} : vector<2x8x8xf32>, vector<2x24x8xf32>, vector<2x8x24xf32> -> vector<2x8x24xf32>
    "tpu.trace_stop"() : () -> ()
    %87 = vector.broadcast %54 : vector<2x1x24xf32> to vector<2x8x24xf32>
    %88 = arith.addf %86, %87 : vector<2x8x24xf32>
    %cst_83 = arith.constant dense<0xFF800000> : vector<2x8xf32>
    %89 = vector.multi_reduction <maximumf>, %88, %cst_83 [2] : vector<2x8x24xf32> to vector<2x8xf32>
    %90 = vector.shape_cast %89 : vector<2x8xf32> to vector<2x8x1xf32>
    %91 = vector.broadcast %90 : vector<2x8x1xf32> to vector<2x8x24xf32>
    %92 = arith.subf %88, %91 : vector<2x8x24xf32>
    %93 = math.exp %92 : vector<2x8x24xf32>
    %cst_84 = arith.constant dense<0.000000e+00> : vector<2x8xf32>
    %94 = vector.multi_reduction <add>, %93, %cst_84 [2] : vector<2x8x24xf32> to vector<2x8xf32>
    %95 = vector.shape_cast %94 : vector<2x8xf32> to vector<2x8x1xf32>
    "tpu.trace_start"() <{level = 10 : i32, message = "bqk,bkd->bqd"}> : () -> ()
    %cst_85 = arith.constant dense<0.000000e+00> : vector<2x8x8xf32>
    %96 = tpu.matmul %93, %85, %cst_85 {dimension_numbers = #tpu.dot_dimension_numbers<[2], [1], [1], [2], [0, 0, 0, 1, 1, 2], [0], [0]>} : vector<2x8x24xf32>, vector<2x24x8xf32>, vector<2x8x8xf32> -> vector<2x8x8xf32>
    "tpu.trace_stop"() : () -> ()
    %97 = tpu.reciprocal %95 {approx = true} : vector<2x8x1xf32> -> vector<2x8x1xf32>
    %98 = vector.broadcast %97 : vector<2x8x1xf32> to vector<2x8x8xf32>
    %99 = arith.mulf %96, %98 : vector<2x8x8xf32>
    %c0_86 = arith.constant 0 : index
    %c0_87 = arith.constant 0 : index
    %c0_88 = arith.constant 0 : index
    %100 = vector.load %arg29[%c0_86, %c0_87, %c0_88] : memref<2x8x32xf32, #tpu.memory_space<vmem>>, vector<2x8x8xf32>
    tpu.vector_store %arg29[%c0_86, %c0_87, %c0_88], %99 {strides = array<i32>} : memref<2x8x32xf32, #tpu.memory_space<vmem>>, vector<2x8x8xf32>,
    %101 = vector.extract_strided_slice %65 {offsets = [0, 8], sizes = [16, 8], strides = [1, 1]} : vector<16x32xf32> to vector<16x8xf32>
    %102 = vector.shape_cast %101 : vector<16x8xf32> to vector<2x8x8xf32>
    %103 = vector.extract_strided_slice %80 {offsets = [0, 0, 8], sizes = [2, 24, 8], strides = [1, 1, 1]} : vector<2x24x32xf32> to vector<2x24x8xf32>
    %104 = vector.extract_strided_slice %81 {offsets = [0, 0, 8], sizes = [2, 24, 8], strides = [1, 1, 1]} : vector<2x24x32xf32> to vector<2x24x8xf32>
    "tpu.trace_start"() <{level = 10 : i32, message = "bqd,bkd->bqk"}> : () -> ()
    %cst_89 = arith.constant dense<0.000000e+00> : vector<2x8x24xf32>
    %105 = tpu.matmul %102, %103, %cst_89 {dimension_numbers = #tpu.dot_dimension_numbers<[2], [2], [1], [1], [0, 0, 0, 1, 1, 1], [0], [0]>} : vector<2x8x8xf32>, vector<2x24x8xf32>, vector<2x8x24xf32> -> vector<2x8x24xf32>
    "tpu.trace_stop"() : () -> ()
    %106 = vector.broadcast %54 : vector<2x1x24xf32> to vector<2x8x24xf32>
    %107 = arith.addf %105, %106 : vector<2x8x24xf32>
    %cst_90 = arith.constant dense<0xFF800000> : vector<2x8xf32>
    %108 = vector.multi_reduction <maximumf>, %107, %cst_90 [2] : vector<2x8x24xf32> to vector<2x8xf32>
    %109 = vector.shape_cast %108 : vector<2x8xf32> to vector<2x8x1xf32>
    %110 = vector.broadcast %109 : vector<2x8x1xf32> to vector<2x8x24xf32>
    %111 = arith.subf %107, %110 : vector<2x8x24xf32>
    %112 = math.exp %111 : vector<2x8x24xf32>
    %cst_91 = arith.constant dense<0.000000e+00> : vector<2x8xf32>
    %113 = vector.multi_reduction <add>, %112, %cst_91 [2] : vector<2x8x24xf32> to vector<2x8xf32>
    %114 = vector.shape_cast %113 : vector<2x8xf32> to vector<2x8x1xf32>
    "tpu.trace_start"() <{level = 10 : i32, message = "bqk,bkd->bqd"}> : () -> ()
    %cst_92 = arith.constant dense<0.000000e+00> : vector<2x8x8xf32>
    %115 = tpu.matmul %112, %104, %cst_92 {dimension_numbers = #tpu.dot_dimension_numbers<[2], [1], [1], [2], [0, 0, 0, 1, 1, 2], [0], [0]>} : vector<2x8x24xf32>, vector<2x24x8xf32>, vector<2x8x8xf32> -> vector<2x8x8xf32>
    "tpu.trace_stop"() : () -> ()
    %116 = tpu.reciprocal %114 {approx = true} : vector<2x8x1xf32> -> vector<2x8x1xf32>
    %117 = vector.broadcast %116 : vector<2x8x1xf32> to vector<2x8x8xf32>
    %118 = arith.mulf %115, %117 : vector<2x8x8xf32>
    %c0_93 = arith.constant 0 : index
    %c0_94 = arith.constant 0 : index
    %c8_95 = arith.constant 8 : index
    %119 = vector.load %arg29[%c0_93, %c0_94, %c8_95] : memref<2x8x32xf32, #tpu.memory_space<vmem>>, vector<2x8x8xf32>
    tpu.vector_store %arg29[%c0_93, %c0_94, %c8_95], %118 {strides = array<i32>} : memref<2x8x32xf32, #tpu.memory_space<vmem>>, vector<2x8x8xf32>,
    %120 = vector.extract_strided_slice %65 {offsets = [0, 16], sizes = [16, 8], strides = [1, 1]} : vector<16x32xf32> to vector<16x8xf32>
    %121 = vector.shape_cast %120 : vector<16x8xf32> to vector<2x8x8xf32>
    %122 = vector.extract_strided_slice %80 {offsets = [0, 0, 16], sizes = [2, 24, 8], strides = [1, 1, 1]} : vector<2x24x32xf32> to vector<2x24x8xf32>
    %123 = vector.extract_strided_slice %81 {offsets = [0, 0, 16], sizes = [2, 24, 8], strides = [1, 1, 1]} : vector<2x24x32xf32> to vector<2x24x8xf32>
    "tpu.trace_start"() <{level = 10 : i32, message = "bqd,bkd->bqk"}> : () -> ()
    %cst_96 = arith.constant dense<0.000000e+00> : vector<2x8x24xf32>
    %124 = tpu.matmul %121, %122, %cst_96 {dimension_numbers = #tpu.dot_dimension_numbers<[2], [2], [1], [1], [0, 0, 0, 1, 1, 1], [0], [0]>} : vector<2x8x8xf32>, vector<2x24x8xf32>, vector<2x8x24xf32> -> vector<2x8x24xf32>
    "tpu.trace_stop"() : () -> ()
    %125 = vector.broadcast %54 : vector<2x1x24xf32> to vector<2x8x24xf32>
    %126 = arith.addf %124, %125 : vector<2x8x24xf32>
    %cst_97 = arith.constant dense<0xFF800000> : vector<2x8xf32>
    %127 = vector.multi_reduction <maximumf>, %126, %cst_97 [2] : vector<2x8x24xf32> to vector<2x8xf32>
    %128 = vector.shape_cast %127 : vector<2x8xf32> to vector<2x8x1xf32>
    %129 = vector.broadcast %128 : vector<2x8x1xf32> to vector<2x8x24xf32>
    %130 = arith.subf %126, %129 : vector<2x8x24xf32>
    %131 = math.exp %130 : vector<2x8x24xf32>
    %cst_98 = arith.constant dense<0.000000e+00> : vector<2x8xf32>
    %132 = vector.multi_reduction <add>, %131, %cst_98 [2] : vector<2x8x24xf32> to vector<2x8xf32>
    %133 = vector.shape_cast %132 : vector<2x8xf32> to vector<2x8x1xf32>
    "tpu.trace_start"() <{level = 10 : i32, message = "bqk,bkd->bqd"}> : () -> ()
    %cst_99 = arith.constant dense<0.000000e+00> : vector<2x8x8xf32>
    %134 = tpu.matmul %131, %123, %cst_99 {dimension_numbers = #tpu.dot_dimension_numbers<[2], [1], [1], [2], [0, 0, 0, 1, 1, 2], [0], [0]>} : vector<2x8x24xf32>, vector<2x24x8xf32>, vector<2x8x8xf32> -> vector<2x8x8xf32>
    "tpu.trace_stop"() : () -> ()
    %135 = tpu.reciprocal %133 {approx = true} : vector<2x8x1xf32> -> vector<2x8x1xf32>
    %136 = vector.broadcast %135 : vector<2x8x1xf32> to vector<2x8x8xf32>
    %137 = arith.mulf %134, %136 : vector<2x8x8xf32>
    %c0_100 = arith.constant 0 : index
    %c0_101 = arith.constant 0 : index
    %c16_102 = arith.constant 16 : index
    %138 = vector.load %arg29[%c0_100, %c0_101, %c16_102] : memref<2x8x32xf32, #tpu.memory_space<vmem>>, vector<2x8x8xf32>
    tpu.vector_store %arg29[%c0_100, %c0_101, %c16_102], %137 {strides = array<i32>} : memref<2x8x32xf32, #tpu.memory_space<vmem>>, vector<2x8x8xf32>,
    %139 = vector.extract_strided_slice %65 {offsets = [0, 24], sizes = [16, 8], strides = [1, 1]} : vector<16x32xf32> to vector<16x8xf32>
    %140 = vector.shape_cast %139 : vector<16x8xf32> to vector<2x8x8xf32>
    %141 = vector.extract_strided_slice %80 {offsets = [0, 0, 24], sizes = [2, 24, 8], strides = [1, 1, 1]} : vector<2x24x32xf32> to vector<2x24x8xf32>
    %142 = vector.extract_strided_slice %81 {offsets = [0, 0, 24], sizes = [2, 24, 8], strides = [1, 1, 1]} : vector<2x24x32xf32> to vector<2x24x8xf32>
    "tpu.trace_start"() <{level = 10 : i32, message = "bqd,bkd->bqk"}> : () -> ()
    %cst_103 = arith.constant dense<0.000000e+00> : vector<2x8x24xf32>
    %143 = tpu.matmul %140, %141, %cst_103 {dimension_numbers = #tpu.dot_dimension_numbers<[2], [2], [1], [1], [0, 0, 0, 1, 1, 1], [0], [0]>} : vector<2x8x8xf32>, vector<2x24x8xf32>, vector<2x8x24xf32> -> vector<2x8x24xf32>
    "tpu.trace_stop"() : () -> ()
    %144 = vector.broadcast %54 : vector<2x1x24xf32> to vector<2x8x24xf32>
    %145 = arith.addf %143, %144 : vector<2x8x24xf32>
    %cst_104 = arith.constant dense<0xFF800000> : vector<2x8xf32>
    %146 = vector.multi_reduction <maximumf>, %145, %cst_104 [2] : vector<2x8x24xf32> to vector<2x8xf32>
    %147 = vector.shape_cast %146 : vector<2x8xf32> to vector<2x8x1xf32>
    %148 = vector.broadcast %147 : vector<2x8x1xf32> to vector<2x8x24xf32>
    %149 = arith.subf %145, %148 : vector<2x8x24xf32>
    %150 = math.exp %149 : vector<2x8x24xf32>
    %cst_105 = arith.constant dense<0.000000e+00> : vector<2x8xf32>
    %151 = vector.multi_reduction <add>, %150, %cst_105 [2] : vector<2x8x24xf32> to vector<2x8xf32>
    %152 = vector.shape_cast %151 : vector<2x8xf32> to vector<2x8x1xf32>
    "tpu.trace_start"() <{level = 10 : i32, message = "bqk,bkd->bqd"}> : () -> ()
    %cst_106 = arith.constant dense<0.000000e+00> : vector<2x8x8xf32>
    %153 = tpu.matmul %150, %142, %cst_106 {dimension_numbers = #tpu.dot_dimension_numbers<[2], [1], [1], [2], [0, 0, 0, 1, 1, 2], [0], [0]>} : vector<2x8x24xf32>, vector<2x24x8xf32>, vector<2x8x8xf32> -> vector<2x8x8xf32>
    "tpu.trace_stop"() : () -> ()
    %154 = tpu.reciprocal %152 {approx = true} : vector<2x8x1xf32> -> vector<2x8x1xf32>
    %155 = vector.broadcast %154 : vector<2x8x1xf32> to vector<2x8x8xf32>
    %156 = arith.mulf %153, %155 : vector<2x8x8xf32>
    %c0_107 = arith.constant 0 : index
    %c0_108 = arith.constant 0 : index
    %c24 = arith.constant 24 : index
    %157 = vector.load %arg29[%c0_107, %c0_108, %c24] : memref<2x8x32xf32, #tpu.memory_space<vmem>>, vector<2x8x8xf32>
    tpu.vector_store %arg29[%c0_107, %c0_108, %c24], %156 {strides = array<i32>} : memref<2x8x32xf32, #tpu.memory_space<vmem>>, vector<2x8x8xf32>,
    %c0_109 = arith.constant 0 : index
    %c0_110 = arith.constant 0 : index
    %c0_111 = arith.constant 0 : index
    %158 = vector.load %arg29[%c0_109, %c0_110, %c0_111] : memref<2x8x32xf32, #tpu.memory_space<vmem>>, vector<2x8x32xf32>
    %159 = vector.shape_cast %158 : vector<2x8x32xf32> to vector<16x32xf32>
    %160 = arith.truncf %159 : vector<16x32xf32> to vector<16x32xbf16>
    %c0_112 = arith.constant 0 : index
    %c0_113 = arith.constant 0 : index
    %c0_114 = arith.constant 0 : index
    %161 = vector.load %arg14[%c0_112, %c0_113, %c0_114] : memref<2x32x32xbf16, #tpu.memory_space<vmem>>, vector<1x32x32xbf16>
    %162 = vector.shape_cast %161 : vector<1x32x32xbf16> to vector<32x32xbf16>
    %cst_115 = arith.constant dense<0.000000e+00> : vector<16x32xf32>
    %163 = tpu.matmul %160, %162, %cst_115 {dimension_numbers = #tpu.dot_dimension_numbers<[1], [0], [0], [1], [0, 0, 1, 1], [], []>} : vector<16x32xbf16>, vector<32x32xbf16>, vector<16x32xf32> -> vector<16x32xf32>
    %164 = arith.addf %52, %163 : vector<16x32xf32>
    %c0_116 = arith.constant 0 : index
    %c0_117 = arith.constant 0 : index
    %c0_118 = arith.constant 0 : index
    %165 = vector.load %arg15[%c0_116, %c0_117, %c0_118] : memref<2x1x32xf32, #tpu.memory_space<vmem>>, vector<1x1x32xf32>
    %166 = vector.shape_cast %165 : vector<1x1x32xf32> to vector<1x32xf32>
    %167 = vector.broadcast %166 : vector<1x32xf32> to vector<16x32xf32>
    %168 = arith.addf %164, %167 : vector<16x32xf32>
    %169 = arith.truncf %168 : vector<16x32xf32> to vector<16x32xbf16>
    %c0_119 = arith.constant 0 : index
    %c0_120 = arith.constant 0 : index
    %c0_121 = arith.constant 0 : index
    %170 = vector.load %arg16[%c0_119, %c0_120, %c0_121] : memref<2x32x64xbf16, #tpu.memory_space<vmem>>, vector<1x32x64xbf16>
    %171 = vector.shape_cast %170 : vector<1x32x64xbf16> to vector<32x64xbf16>
    %cst_122 = arith.constant dense<0.000000e+00> : vector<16x64xf32>
    %172 = tpu.matmul %169, %171, %cst_122 {dimension_numbers = #tpu.dot_dimension_numbers<[1], [0], [0], [1], [0, 0, 1, 1], [], []>} : vector<16x32xbf16>, vector<32x64xbf16>, vector<16x64xf32> -> vector<16x64xf32>
    %c0_123 = arith.constant 0 : index
    %c0_124 = arith.constant 0 : index
    %c0_125 = arith.constant 0 : index
    %173 = vector.load %arg17[%c0_123, %c0_124, %c0_125] : memref<2x1x64xf32, #tpu.memory_space<vmem>>, vector<1x1x64xf32>
    %174 = vector.shape_cast %173 : vector<1x1x64xf32> to vector<1x64xf32>
    %175 = vector.broadcast %174 : vector<1x64xf32> to vector<16x64xf32>
    %176 = arith.addf %172, %175 : vector<16x64xf32>
    %cst_126 = arith.constant 0.000000e+00 : f32
    %177 = vector.broadcast %cst_126 : f32 to vector<16x64xf32>
    %178 = arith.maximumf %176, %177 : vector<16x64xf32>
    %179 = arith.truncf %178 : vector<16x64xf32> to vector<16x64xbf16>
    %c0_127 = arith.constant 0 : index
    %c0_128 = arith.constant 0 : index
    %c0_129 = arith.constant 0 : index
    %180 = vector.load %arg18[%c0_127, %c0_128, %c0_129] : memref<2x64x32xbf16, #tpu.memory_space<vmem>>, vector<1x64x32xbf16>
    %181 = vector.shape_cast %180 : vector<1x64x32xbf16> to vector<64x32xbf16>
    %cst_130 = arith.constant dense<0.000000e+00> : vector<16x32xf32>
    %182 = tpu.matmul %179, %181, %cst_130 {dimension_numbers = #tpu.dot_dimension_numbers<[1], [0], [0], [1], [0, 0, 1, 1], [], []>} : vector<16x64xbf16>, vector<64x32xbf16>, vector<16x32xf32> -> vector<16x32xf32>
    %183 = arith.addf %168, %182 : vector<16x32xf32>
    %c0_131 = arith.constant 0 : index
    %c0_132 = arith.constant 0 : index
    %c0_133 = arith.constant 0 : index
    %184 = vector.load %arg19[%c0_131, %c0_132, %c0_133] : memref<2x1x32xf32, #tpu.memory_space<vmem>>, vector<1x1x32xf32>
    %185 = vector.shape_cast %184 : vector<1x1x32xf32> to vector<1x32xf32>
    %186 = vector.broadcast %185 : vector<1x32xf32> to vector<16x32xf32>
    %187 = arith.addf %183, %186 : vector<16x32xf32>
    %188 = arith.truncf %187 : vector<16x32xf32> to vector<16x32xbf16>
    %c1 = arith.constant 1 : index
    %c0_134 = arith.constant 0 : index
    %c0_135 = arith.constant 0 : index
    %189 = vector.load %arg12[%c1, %c0_134, %c0_135] : memref<2x32x96xbf16, #tpu.memory_space<vmem>>, vector<1x32x96xbf16>
    %190 = vector.shape_cast %189 : vector<1x32x96xbf16> to vector<32x96xbf16>
    %cst_136 = arith.constant dense<0.000000e+00> : vector<16x96xf32>
    %191 = tpu.matmul %188, %190, %cst_136 {dimension_numbers = #tpu.dot_dimension_numbers<[1], [0], [0], [1], [0, 0, 1, 1], [], []>} : vector<16x32xbf16>, vector<32x96xbf16>, vector<16x96xf32> -> vector<16x96xf32>
    %c1_137 = arith.constant 1 : index
    %c0_138 = arith.constant 0 : index
    %c0_139 = arith.constant 0 : index
    %192 = vector.load %arg13[%c1_137, %c0_138, %c0_139] : memref<2x1x96xf32, #tpu.memory_space<vmem>>, vector<1x1x96xf32>
    %193 = vector.shape_cast %192 : vector<1x1x96xf32> to vector<1x96xf32>
    %194 = vector.broadcast %193 : vector<1x96xf32> to vector<16x96xf32>
    %195 = arith.addf %191, %194 : vector<16x96xf32>
    %196 = vector.extract_strided_slice %195 {offsets = [0, 0], sizes = [16, 32], strides = [1, 1]} : vector<16x96xf32> to vector<16x32xf32>
    %cst_140 = arith.constant 0.353553385 : f32
    %197 = vector.broadcast %cst_140 : f32 to vector<16x32xf32>
    %198 = arith.mulf %196, %197 : vector<16x32xf32>
    %199 = vector.extract_strided_slice %195 {offsets = [0, 32], sizes = [16, 32], strides = [1, 1]} : vector<16x96xf32> to vector<16x32xf32>
    %200 = vector.extract_strided_slice %195 {offsets = [0, 64], sizes = [16, 32], strides = [1, 1]} : vector<16x96xf32> to vector<16x32xf32>
    %c0_141 = arith.constant 0 : index
    %c0_142 = arith.constant 0 : index
    %c0_143 = arith.constant 0 : index
    %201 = vector.load %arg5[%c0_141, %c0_142, %c0_143] : memref<2x16x32xf32, #tpu.memory_space<vmem>>, vector<2x16x32xf32>
    %c0_144 = arith.constant 0 : index
    %c0_145 = arith.constant 0 : index
    %c0_146 = arith.constant 0 : index
    %202 = vector.load %arg27[%c0_144, %c0_145, %c0_146] : memref<2x24x32xf32, #tpu.memory_space<vmem>>, vector<2x16x32xf32>
    tpu.vector_store %arg27[%c0_144, %c0_145, %c0_146], %201 {strides = array<i32>} : memref<2x24x32xf32, #tpu.memory_space<vmem>>, vector<2x16x32xf32>,
    %203 = vector.shape_cast %199 : vector<16x32xf32> to vector<2x8x32xf32>
    %c0_147 = arith.constant 0 : index
    %c16_148 = arith.constant 16 : index
    %c0_149 = arith.constant 0 : index
    %204 = vector.load %arg27[%c0_147, %c16_148, %c0_149] : memref<2x24x32xf32, #tpu.memory_space<vmem>>, vector<2x8x32xf32>
    tpu.vector_store %arg27[%c0_147, %c16_148, %c0_149], %203 {strides = array<i32>} : memref<2x24x32xf32, #tpu.memory_space<vmem>>, vector<2x8x32xf32>,
    %c0_150 = arith.constant 0 : index
    %c0_151 = arith.constant 0 : index
    %c0_152 = arith.constant 0 : index
    %205 = vector.load %arg6[%c0_150, %c0_151, %c0_152] : memref<2x16x32xf32, #tpu.memory_space<vmem>>, vector<2x16x32xf32>
    %c0_153 = arith.constant 0 : index
    %c0_154 = arith.constant 0 : index
    %c0_155 = arith.constant 0 : index
    %206 = vector.load %arg28[%c0_153, %c0_154, %c0_155] : memref<2x24x32xf32, #tpu.memory_space<vmem>>, vector<2x16x32xf32>
    tpu.vector_store %arg28[%c0_153, %c0_154, %c0_155], %205 {strides = array<i32>} : memref<2x24x32xf32, #tpu.memory_space<vmem>>, vector<2x16x32xf32>,
    %207 = vector.shape_cast %200 : vector<16x32xf32> to vector<2x8x32xf32>
    %c0_156 = arith.constant 0 : index
    %c16_157 = arith.constant 16 : index
    %c0_158 = arith.constant 0 : index
    %208 = vector.load %arg28[%c0_156, %c16_157, %c0_158] : memref<2x24x32xf32, #tpu.memory_space<vmem>>, vector<2x8x32xf32>
    tpu.vector_store %arg28[%c0_156, %c16_157, %c0_158], %207 {strides = array<i32>} : memref<2x24x32xf32, #tpu.memory_space<vmem>>, vector<2x8x32xf32>,
    %c0_159 = arith.constant 0 : index
    %c8_160 = arith.constant 8 : index
    %c0_161 = arith.constant 0 : index
    %209 = vector.load %arg27[%c0_159, %c8_160, %c0_161] : memref<2x24x32xf32, #tpu.memory_space<vmem>>, vector<2x16x32xf32>
    %c0_162 = arith.constant 0 : index
    %c0_163 = arith.constant 0 : index
    %c0_164 = arith.constant 0 : index
    %210 = vector.load %arg24[%c0_162, %c0_163, %c0_164] : memref<2x16x32xf32, #tpu.memory_space<vmem>>, vector<2x16x32xf32>
    tpu.vector_store %arg24[%c0_162, %c0_163, %c0_164], %209 {strides = array<i32>} : memref<2x16x32xf32, #tpu.memory_space<vmem>>, vector<2x16x32xf32>,
    %c0_165 = arith.constant 0 : index
    %c8_166 = arith.constant 8 : index
    %c0_167 = arith.constant 0 : index
    %211 = vector.load %arg28[%c0_165, %c8_166, %c0_167] : memref<2x24x32xf32, #tpu.memory_space<vmem>>, vector<2x16x32xf32>
    %c0_168 = arith.constant 0 : index
    %c0_169 = arith.constant 0 : index
    %c0_170 = arith.constant 0 : index
    %212 = vector.load %arg25[%c0_168, %c0_169, %c0_170] : memref<2x16x32xf32, #tpu.memory_space<vmem>>, vector<2x16x32xf32>
    tpu.vector_store %arg25[%c0_168, %c0_169, %c0_170], %211 {strides = array<i32>} : memref<2x16x32xf32, #tpu.memory_space<vmem>>, vector<2x16x32xf32>,
    %c0_171 = arith.constant 0 : index
    %c0_172 = arith.constant 0 : index
    %c0_173 = arith.constant 0 : index
    %213 = vector.load %arg27[%c0_171, %c0_172, %c0_173] : memref<2x24x32xf32, #tpu.memory_space<vmem>>, vector<2x24x32xf32>
    %c0_174 = arith.constant 0 : index
    %c0_175 = arith.constant 0 : index
    %c0_176 = arith.constant 0 : index
    %214 = vector.load %arg28[%c0_174, %c0_175, %c0_176] : memref<2x24x32xf32, #tpu.memory_space<vmem>>, vector<2x24x32xf32>
    %215 = vector.extract_strided_slice %198 {offsets = [0, 0], sizes = [16, 8], strides = [1, 1]} : vector<16x32xf32> to vector<16x8xf32>
    %216 = vector.shape_cast %215 : vector<16x8xf32> to vector<2x8x8xf32>
    %217 = vector.extract_strided_slice %213 {offsets = [0, 0, 0], sizes = [2, 24, 8], strides = [1, 1, 1]} : vector<2x24x32xf32> to vector<2x24x8xf32>
    %218 = vector.extract_strided_slice %214 {offsets = [0, 0, 0], sizes = [2, 24, 8], strides = [1, 1, 1]} : vector<2x24x32xf32> to vector<2x24x8xf32>
    "tpu.trace_start"() <{level = 10 : i32, message = "bqd,bkd->bqk"}> : () -> ()
    %cst_177 = arith.constant dense<0.000000e+00> : vector<2x8x24xf32>
    %219 = tpu.matmul %216, %217, %cst_177 {dimension_numbers = #tpu.dot_dimension_numbers<[2], [2], [1], [1], [0, 0, 0, 1, 1, 1], [0], [0]>} : vector<2x8x8xf32>, vector<2x24x8xf32>, vector<2x8x24xf32> -> vector<2x8x24xf32>
    "tpu.trace_stop"() : () -> ()
    %220 = vector.broadcast %54 : vector<2x1x24xf32> to vector<2x8x24xf32>
    %221 = arith.addf %219, %220 : vector<2x8x24xf32>
    %cst_178 = arith.constant dense<0xFF800000> : vector<2x8xf32>
    %222 = vector.multi_reduction <maximumf>, %221, %cst_178 [2] : vector<2x8x24xf32> to vector<2x8xf32>
    %223 = vector.shape_cast %222 : vector<2x8xf32> to vector<2x8x1xf32>
    %224 = vector.broadcast %223 : vector<2x8x1xf32> to vector<2x8x24xf32>
    %225 = arith.subf %221, %224 : vector<2x8x24xf32>
    %226 = math.exp %225 : vector<2x8x24xf32>
    %cst_179 = arith.constant dense<0.000000e+00> : vector<2x8xf32>
    %227 = vector.multi_reduction <add>, %226, %cst_179 [2] : vector<2x8x24xf32> to vector<2x8xf32>
    %228 = vector.shape_cast %227 : vector<2x8xf32> to vector<2x8x1xf32>
    "tpu.trace_start"() <{level = 10 : i32, message = "bqk,bkd->bqd"}> : () -> ()
    %cst_180 = arith.constant dense<0.000000e+00> : vector<2x8x8xf32>
    %229 = tpu.matmul %226, %218, %cst_180 {dimension_numbers = #tpu.dot_dimension_numbers<[2], [1], [1], [2], [0, 0, 0, 1, 1, 2], [0], [0]>} : vector<2x8x24xf32>, vector<2x24x8xf32>, vector<2x8x8xf32> -> vector<2x8x8xf32>
    "tpu.trace_stop"() : () -> ()
    %230 = tpu.reciprocal %228 {approx = true} : vector<2x8x1xf32> -> vector<2x8x1xf32>
    %231 = vector.broadcast %230 : vector<2x8x1xf32> to vector<2x8x8xf32>
    %232 = arith.mulf %229, %231 : vector<2x8x8xf32>
    %c0_181 = arith.constant 0 : index
    %c0_182 = arith.constant 0 : index
    %c0_183 = arith.constant 0 : index
    %233 = vector.load %arg29[%c0_181, %c0_182, %c0_183] : memref<2x8x32xf32, #tpu.memory_space<vmem>>, vector<2x8x8xf32>
    tpu.vector_store %arg29[%c0_181, %c0_182, %c0_183], %232 {strides = array<i32>} : memref<2x8x32xf32, #tpu.memory_space<vmem>>, vector<2x8x8xf32>,
    %234 = vector.extract_strided_slice %198 {offsets = [0, 8], sizes = [16, 8], strides = [1, 1]} : vector<16x32xf32> to vector<16x8xf32>
    %235 = vector.shape_cast %234 : vector<16x8xf32> to vector<2x8x8xf32>
    %236 = vector.extract_strided_slice %213 {offsets = [0, 0, 8], sizes = [2, 24, 8], strides = [1, 1, 1]} : vector<2x24x32xf32> to vector<2x24x8xf32>
    %237 = vector.extract_strided_slice %214 {offsets = [0, 0, 8], sizes = [2, 24, 8], strides = [1, 1, 1]} : vector<2x24x32xf32> to vector<2x24x8xf32>
    "tpu.trace_start"() <{level = 10 : i32, message = "bqd,bkd->bqk"}> : () -> ()
    %cst_184 = arith.constant dense<0.000000e+00> : vector<2x8x24xf32>
    %238 = tpu.matmul %235, %236, %cst_184 {dimension_numbers = #tpu.dot_dimension_numbers<[2], [2], [1], [1], [0, 0, 0, 1, 1, 1], [0], [0]>} : vector<2x8x8xf32>, vector<2x24x8xf32>, vector<2x8x24xf32> -> vector<2x8x24xf32>
    "tpu.trace_stop"() : () -> ()
    %239 = vector.broadcast %54 : vector<2x1x24xf32> to vector<2x8x24xf32>
    %240 = arith.addf %238, %239 : vector<2x8x24xf32>
    %cst_185 = arith.constant dense<0xFF800000> : vector<2x8xf32>
    %241 = vector.multi_reduction <maximumf>, %240, %cst_185 [2] : vector<2x8x24xf32> to vector<2x8xf32>
    %242 = vector.shape_cast %241 : vector<2x8xf32> to vector<2x8x1xf32>
    %243 = vector.broadcast %242 : vector<2x8x1xf32> to vector<2x8x24xf32>
    %244 = arith.subf %240, %243 : vector<2x8x24xf32>
    %245 = math.exp %244 : vector<2x8x24xf32>
    %cst_186 = arith.constant dense<0.000000e+00> : vector<2x8xf32>
    %246 = vector.multi_reduction <add>, %245, %cst_186 [2] : vector<2x8x24xf32> to vector<2x8xf32>
    %247 = vector.shape_cast %246 : vector<2x8xf32> to vector<2x8x1xf32>
    "tpu.trace_start"() <{level = 10 : i32, message = "bqk,bkd->bqd"}> : () -> ()
    %cst_187 = arith.constant dense<0.000000e+00> : vector<2x8x8xf32>
    %248 = tpu.matmul %245, %237, %cst_187 {dimension_numbers = #tpu.dot_dimension_numbers<[2], [1], [1], [2], [0, 0, 0, 1, 1, 2], [0], [0]>} : vector<2x8x24xf32>, vector<2x24x8xf32>, vector<2x8x8xf32> -> vector<2x8x8xf32>
    "tpu.trace_stop"() : () -> ()
    %249 = tpu.reciprocal %247 {approx = true} : vector<2x8x1xf32> -> vector<2x8x1xf32>
    %250 = vector.broadcast %249 : vector<2x8x1xf32> to vector<2x8x8xf32>
    %251 = arith.mulf %248, %250 : vector<2x8x8xf32>
    %c0_188 = arith.constant 0 : index
    %c0_189 = arith.constant 0 : index
    %c8_190 = arith.constant 8 : index
    %252 = vector.load %arg29[%c0_188, %c0_189, %c8_190] : memref<2x8x32xf32, #tpu.memory_space<vmem>>, vector<2x8x8xf32>
    tpu.vector_store %arg29[%c0_188, %c0_189, %c8_190], %251 {strides = array<i32>} : memref<2x8x32xf32, #tpu.memory_space<vmem>>, vector<2x8x8xf32>,
    %253 = vector.extract_strided_slice %198 {offsets = [0, 16], sizes = [16, 8], strides = [1, 1]} : vector<16x32xf32> to vector<16x8xf32>
    %254 = vector.shape_cast %253 : vector<16x8xf32> to vector<2x8x8xf32>
    %255 = vector.extract_strided_slice %213 {offsets = [0, 0, 16], sizes = [2, 24, 8], strides = [1, 1, 1]} : vector<2x24x32xf32> to vector<2x24x8xf32>
    %256 = vector.extract_strided_slice %214 {offsets = [0, 0, 16], sizes = [2, 24, 8], strides = [1, 1, 1]} : vector<2x24x32xf32> to vector<2x24x8xf32>
    "tpu.trace_start"() <{level = 10 : i32, message = "bqd,bkd->bqk"}> : () -> ()
    %cst_191 = arith.constant dense<0.000000e+00> : vector<2x8x24xf32>
    %257 = tpu.matmul %254, %255, %cst_191 {dimension_numbers = #tpu.dot_dimension_numbers<[2], [2], [1], [1], [0, 0, 0, 1, 1, 1], [0], [0]>} : vector<2x8x8xf32>, vector<2x24x8xf32>, vector<2x8x24xf32> -> vector<2x8x24xf32>
    "tpu.trace_stop"() : () -> ()
    %258 = vector.broadcast %54 : vector<2x1x24xf32> to vector<2x8x24xf32>
    %259 = arith.addf %257, %258 : vector<2x8x24xf32>
    %cst_192 = arith.constant dense<0xFF800000> : vector<2x8xf32>
    %260 = vector.multi_reduction <maximumf>, %259, %cst_192 [2] : vector<2x8x24xf32> to vector<2x8xf32>
    %261 = vector.shape_cast %260 : vector<2x8xf32> to vector<2x8x1xf32>
    %262 = vector.broadcast %261 : vector<2x8x1xf32> to vector<2x8x24xf32>
    %263 = arith.subf %259, %262 : vector<2x8x24xf32>
    %264 = math.exp %263 : vector<2x8x24xf32>
    %cst_193 = arith.constant dense<0.000000e+00> : vector<2x8xf32>
    %265 = vector.multi_reduction <add>, %264, %cst_193 [2] : vector<2x8x24xf32> to vector<2x8xf32>
    %266 = vector.shape_cast %265 : vector<2x8xf32> to vector<2x8x1xf32>
    "tpu.trace_start"() <{level = 10 : i32, message = "bqk,bkd->bqd"}> : () -> ()
    %cst_194 = arith.constant dense<0.000000e+00> : vector<2x8x8xf32>
    %267 = tpu.matmul %264, %256, %cst_194 {dimension_numbers = #tpu.dot_dimension_numbers<[2], [1], [1], [2], [0, 0, 0, 1, 1, 2], [0], [0]>} : vector<2x8x24xf32>, vector<2x24x8xf32>, vector<2x8x8xf32> -> vector<2x8x8xf32>
    "tpu.trace_stop"() : () -> ()
    %268 = tpu.reciprocal %266 {approx = true} : vector<2x8x1xf32> -> vector<2x8x1xf32>
    %269 = vector.broadcast %268 : vector<2x8x1xf32> to vector<2x8x8xf32>
    %270 = arith.mulf %267, %269 : vector<2x8x8xf32>
    %c0_195 = arith.constant 0 : index
    %c0_196 = arith.constant 0 : index
    %c16_197 = arith.constant 16 : index
    %271 = vector.load %arg29[%c0_195, %c0_196, %c16_197] : memref<2x8x32xf32, #tpu.memory_space<vmem>>, vector<2x8x8xf32>
    tpu.vector_store %arg29[%c0_195, %c0_196, %c16_197], %270 {strides = array<i32>} : memref<2x8x32xf32, #tpu.memory_space<vmem>>, vector<2x8x8xf32>,
    %272 = vector.extract_strided_slice %198 {offsets = [0, 24], sizes = [16, 8], strides = [1, 1]} : vector<16x32xf32> to vector<16x8xf32>
    %273 = vector.shape_cast %272 : vector<16x8xf32> to vector<2x8x8xf32>
    %274 = vector.extract_strided_slice %213 {offsets = [0, 0, 24], sizes = [2, 24, 8], strides = [1, 1, 1]} : vector<2x24x32xf32> to vector<2x24x8xf32>
    %275 = vector.extract_strided_slice %214 {offsets = [0, 0, 24], sizes = [2, 24, 8], strides = [1, 1, 1]} : vector<2x24x32xf32> to vector<2x24x8xf32>
    "tpu.trace_start"() <{level = 10 : i32, message = "bqd,bkd->bqk"}> : () -> ()
    %cst_198 = arith.constant dense<0.000000e+00> : vector<2x8x24xf32>
    %276 = tpu.matmul %273, %274, %cst_198 {dimension_numbers = #tpu.dot_dimension_numbers<[2], [2], [1], [1], [0, 0, 0, 1, 1, 1], [0], [0]>} : vector<2x8x8xf32>, vector<2x24x8xf32>, vector<2x8x24xf32> -> vector<2x8x24xf32>
    "tpu.trace_stop"() : () -> ()
    %277 = vector.broadcast %54 : vector<2x1x24xf32> to vector<2x8x24xf32>
    %278 = arith.addf %276, %277 : vector<2x8x24xf32>
    %cst_199 = arith.constant dense<0xFF800000> : vector<2x8xf32>
    %279 = vector.multi_reduction <maximumf>, %278, %cst_199 [2] : vector<2x8x24xf32> to vector<2x8xf32>
    %280 = vector.shape_cast %279 : vector<2x8xf32> to vector<2x8x1xf32>
    %281 = vector.broadcast %280 : vector<2x8x1xf32> to vector<2x8x24xf32>
    %282 = arith.subf %278, %281 : vector<2x8x24xf32>
    %283 = math.exp %282 : vector<2x8x24xf32>
    %cst_200 = arith.constant dense<0.000000e+00> : vector<2x8xf32>
    %284 = vector.multi_reduction <add>, %283, %cst_200 [2] : vector<2x8x24xf32> to vector<2x8xf32>
    %285 = vector.shape_cast %284 : vector<2x8xf32> to vector<2x8x1xf32>
    "tpu.trace_start"() <{level = 10 : i32, message = "bqk,bkd->bqd"}> : () -> ()
    %cst_201 = arith.constant dense<0.000000e+00> : vector<2x8x8xf32>
    %286 = tpu.matmul %283, %275, %cst_201 {dimension_numbers = #tpu.dot_dimension_numbers<[2], [1], [1], [2], [0, 0, 0, 1, 1, 2], [0], [0]>} : vector<2x8x24xf32>, vector<2x24x8xf32>, vector<2x8x8xf32> -> vector<2x8x8xf32>
    "tpu.trace_stop"() : () -> ()
    %287 = tpu.reciprocal %285 {approx = true} : vector<2x8x1xf32> -> vector<2x8x1xf32>
    %288 = vector.broadcast %287 : vector<2x8x1xf32> to vector<2x8x8xf32>
    %289 = arith.mulf %286, %288 : vector<2x8x8xf32>
    %c0_202 = arith.constant 0 : index
    %c0_203 = arith.constant 0 : index
    %c24_204 = arith.constant 24 : index
    %290 = vector.load %arg29[%c0_202, %c0_203, %c24_204] : memref<2x8x32xf32, #tpu.memory_space<vmem>>, vector<2x8x8xf32>
    tpu.vector_store %arg29[%c0_202, %c0_203, %c24_204], %289 {strides = array<i32>} : memref<2x8x32xf32, #tpu.memory_space<vmem>>, vector<2x8x8xf32>,
    %c0_205 = arith.constant 0 : index
    %c0_206 = arith.constant 0 : index
    %c0_207 = arith.constant 0 : index
    %291 = vector.load %arg29[%c0_205, %c0_206, %c0_207] : memref<2x8x32xf32, #tpu.memory_space<vmem>>, vector<2x8x32xf32>
    %292 = vector.shape_cast %291 : vector<2x8x32xf32> to vector<16x32xf32>
    %293 = arith.truncf %292 : vector<16x32xf32> to vector<16x32xbf16>
    %c1_208 = arith.constant 1 : index
    %c0_209 = arith.constant 0 : index
    %c0_210 = arith.constant 0 : index
    %294 = vector.load %arg14[%c1_208, %c0_209, %c0_210] : memref<2x32x32xbf16, #tpu.memory_space<vmem>>, vector<1x32x32xbf16>
    %295 = vector.shape_cast %294 : vector<1x32x32xbf16> to vector<32x32xbf16>
    %cst_211 = arith.constant dense<0.000000e+00> : vector<16x32xf32>
    %296 = tpu.matmul %293, %295, %cst_211 {dimension_numbers = #tpu.dot_dimension_numbers<[1], [0], [0], [1], [0, 0, 1, 1], [], []>} : vector<16x32xbf16>, vector<32x32xbf16>, vector<16x32xf32> -> vector<16x32xf32>
    %297 = arith.addf %187, %296 : vector<16x32xf32>
    %c1_212 = arith.constant 1 : index
    %c0_213 = arith.constant 0 : index
    %c0_214 = arith.constant 0 : index
    %298 = vector.load %arg15[%c1_212, %c0_213, %c0_214] : memref<2x1x32xf32, #tpu.memory_space<vmem>>, vector<1x1x32xf32>
    %299 = vector.shape_cast %298 : vector<1x1x32xf32> to vector<1x32xf32>
    %300 = vector.broadcast %299 : vector<1x32xf32> to vector<16x32xf32>
    %301 = arith.addf %297, %300 : vector<16x32xf32>
    %302 = arith.truncf %301 : vector<16x32xf32> to vector<16x32xbf16>
    %c1_215 = arith.constant 1 : index
    %c0_216 = arith.constant 0 : index
    %c0_217 = arith.constant 0 : index
    %303 = vector.load %arg16[%c1_215, %c0_216, %c0_217] : memref<2x32x64xbf16, #tpu.memory_space<vmem>>, vector<1x32x64xbf16>
    %304 = vector.shape_cast %303 : vector<1x32x64xbf16> to vector<32x64xbf16>
    %cst_218 = arith.constant dense<0.000000e+00> : vector<16x64xf32>
    %305 = tpu.matmul %302, %304, %cst_218 {dimension_numbers = #tpu.dot_dimension_numbers<[1], [0], [0], [1], [0, 0, 1, 1], [], []>} : vector<16x32xbf16>, vector<32x64xbf16>, vector<16x64xf32> -> vector<16x64xf32>
    %c1_219 = arith.constant 1 : index
    %c0_220 = arith.constant 0 : index
    %c0_221 = arith.constant 0 : index
    %306 = vector.load %arg17[%c1_219, %c0_220, %c0_221] : memref<2x1x64xf32, #tpu.memory_space<vmem>>, vector<1x1x64xf32>
    %307 = vector.shape_cast %306 : vector<1x1x64xf32> to vector<1x64xf32>
    %308 = vector.broadcast %307 : vector<1x64xf32> to vector<16x64xf32>
    %309 = arith.addf %305, %308 : vector<16x64xf32>
    %cst_222 = arith.constant 0.000000e+00 : f32
    %310 = vector.broadcast %cst_222 : f32 to vector<16x64xf32>
    %311 = arith.maximumf %309, %310 : vector<16x64xf32>
    %312 = arith.truncf %311 : vector<16x64xf32> to vector<16x64xbf16>
    %c1_223 = arith.constant 1 : index
    %c0_224 = arith.constant 0 : index
    %c0_225 = arith.constant 0 : index
    %313 = vector.load %arg18[%c1_223, %c0_224, %c0_225] : memref<2x64x32xbf16, #tpu.memory_space<vmem>>, vector<1x64x32xbf16>
    %314 = vector.shape_cast %313 : vector<1x64x32xbf16> to vector<64x32xbf16>
    %cst_226 = arith.constant dense<0.000000e+00> : vector<16x32xf32>
    %315 = tpu.matmul %312, %314, %cst_226 {dimension_numbers = #tpu.dot_dimension_numbers<[1], [0], [0], [1], [0, 0, 1, 1], [], []>} : vector<16x64xbf16>, vector<64x32xbf16>, vector<16x32xf32> -> vector<16x32xf32>
    %316 = arith.addf %301, %315 : vector<16x32xf32>
    %c1_227 = arith.constant 1 : index
    %c0_228 = arith.constant 0 : index
    %c0_229 = arith.constant 0 : index
    %317 = vector.load %arg19[%c1_227, %c0_228, %c0_229] : memref<2x1x32xf32, #tpu.memory_space<vmem>>, vector<1x1x32xf32>
    %318 = vector.shape_cast %317 : vector<1x1x32xf32> to vector<1x32xf32>
    %319 = vector.broadcast %318 : vector<1x32xf32> to vector<16x32xf32>
    %320 = arith.addf %316, %319 : vector<16x32xf32>
    %321 = vector.shape_cast %320 : vector<16x32xf32> to vector<2x8x32xf32>
    %c0_230 = arith.constant 0 : index
    %c0_231 = arith.constant 0 : index
    %c0_232 = arith.constant 0 : index
    %322 = vector.load %arg20[%c0_230, %c0_231, %c0_232] : memref<2x8x32xf32, #tpu.memory_space<vmem>>, vector<2x8x32xf32>
    tpu.vector_store %arg20[%c0_230, %c0_231, %c0_232], %321 {strides = array<i32>} : memref<2x8x32xf32, #tpu.memory_space<vmem>>, vector<2x8x32xf32>,
    return
  }
}

</mosaic_0001>

<bundles_post_ra>
// kernel: streaming_encoder_forward.1
= control target key start
LH: loop header
LB: loop body
LE: loop exit
PB: predicated region body
PF: predicated region fallthrough
CT: control target
= control target key end

     0   :  { %s3368_s0 = inlined_call_operand.vmem [shape: f32[2,16,16], index: 0, kind: input, shape index: {}]   ;;  %s3369_s1 = inlined_call_operand.vmem [shape: f32[2,4,32], index: 1, kind: input, shape index: {}]   ;;  %s3370_s2 = inlined_call_operand.vmem [shape: f32[2,24], index: 2, kind: input, shape index: {}]   ;;  %s3371_s3 = inlined_call_operand.vmem [shape: f32[2,16,32], index: 3, kind: input, shape index: {}, may-alias: {3,22}]   ;;  %s3372_s4 = inlined_call_operand.vmem [shape: f32[2,16,32], index: 4, kind: input, shape index: {}, may-alias: {4,23}]   ;;  %s3373_s5 = inlined_call_operand.vmem [shape: f32[2,16,32], index: 5, kind: input, shape index: {}, may-alias: {5,24}]   ;;  %s3374_s6 = inlined_call_operand.vmem [shape: f32[2,16,32], index: 6, kind: input, shape index: {}, may-alias: {6,25}]   ;;  %s3375_s7 = inlined_call_operand.vmem [shape: bf16[16,32], index: 7, kind: input, shape index: {}]   ;;  %s3376_s8 = inlined_call_operand.vmem [shape: f32[1,32], index: 8, kind: input, shape index: {}]   ;;  %s3377_s9 = inlined_call_operand.vmem [shape: f32[5,32], index: 9, kind: input, shape index: {}]   ;;  %s3378_s10 = inlined_call_operand.vmem [shape: bf16[32,32], index: 10, kind: input, shape index: {}]   ;;  %s3379_s11 = inlined_call_operand.vmem [shape: f32[1,32], index: 11, kind: input, shape index: {}]   ;;  %s3380_s12 = inlined_call_operand.vmem [shape: bf16[2,32,96], index: 12, kind: input, shape index: {}]   ;;  %s3381_s13 = inlined_call_operand.vmem [shape: f32[2,1,96], index: 13, kind: input, shape index: {}]   ;;  %s3382_s14 = inlined_call_operand.vmem [shape: bf16[2,32,32], index: 14, kind: input, shape index: {}]   ;;  %s3383_s15 = inlined_call_operand.vmem [shape: f32[2,1,32], index: 15, kind: input, shape index: {}]   ;;  %s3384_s16 = inlined_call_operand.vmem [shape: bf16[2,32,64], index: 16, kind: input, shape index: {}]   ;;  %s3385_s17 = inlined_call_operand.vmem [shape: f32[2,1,64], index: 17, kind: input, shape index: {}]   ;;  %s3386_s18 = inlined_call_operand.vmem [shape: bf16[2,64,32], index: 18, kind: input, shape index: {}]   ;;  %s3387_s19 = inlined_call_operand.vmem [shape: f32[2,1,32], index: 19, kind: input, shape index: {}]   ;;  %s3388_s20 = inlined_call_operand.hbm [shape: f32[2,8,32], index: 20, kind: output, shape index: {0}]   ;;  %s3389_s21 = inlined_call_operand.vmem [shape: f32[2,4,32], index: 21, kind: output, shape index: {1}]   ;;  %s3390_s22 = inlined_call_operand.vmem [shape: f32[2,16,32], index: 22, kind: output, shape index: {2}, may-alias: {3,22}]   ;;  %s3391_s23 = inlined_call_operand.vmem [shape: f32[2,16,32], index: 23, kind: output, shape index: {3}, may-alias: {4,23}]   ;;  %s3392_s24 = inlined_call_operand.vmem [shape: f32[2,16,32], index: 24, kind: output, shape index: {4}, may-alias: {5,24}]   ;;  %s3393_s25 = inlined_call_operand.vmem [shape: f32[2,16,32], index: 25, kind: output, shape index: {5}, may-alias: {6,25}]  }
   0x1   :  { %3400 = sst [smem:[#allocation9_spill]] %s3368_s0 }
   0x2   :  { %3401 = sst [smem:[#allocation10_spill]] %s3369_s1 }
   0x3   :  { %3402 = sst [smem:[#allocation11_spill]] %s3370_s2 }
   0x4   :  { %3403 = sst [smem:[#allocation12_spill]] %s3371_s3 }
   0x5   :  { %3404 = sst [smem:[#allocation13_spill]] %s3372_s4 }
   0x6   :  { %3405 = sst [smem:[#allocation14_spill]] %s3373_s5 }
   0x7   :  { %3406 = sst [smem:[#allocation15_spill]] %s3374_s6 }
   0x8   :  { %3407 = sst [smem:[#allocation16_spill]] %s3375_s7 }
   0x9   :  { %3408 = sst [smem:[#allocation17_spill]] %s3376_s8 }
   0xa   :  { %3409 = sst [smem:[#allocation18_spill]] %s3377_s9 }
   0xb   :  { %3410 = sst [smem:[#allocation19_spill]] %s3388_s20 }
   0xc   :  { %s3411_s6 = sld [smem:[#allocation16_spill]]  ;;  %vm91_vm0 = vcmask 130048  }
   0xd   :  { %s3412_s20 = sld [smem:[#allocation9_spill]] }
  0x12   :  { %v2259_v0 = vld [vmem:[%s3411_s6] sm:$0xff] }
  0x13   :  { %v73_v1 = vld [vmem:[%s3412_s20] sm:$0xff]  ;;  %v74_v2 = vld [vmem:[%s3412_s20 + $0x8] sm:$0xff]  ;;  %105 = vmatpush.bf16.msra.mxu0 %v2259_v0 }
  0x14   :  { %v77_v3 = vpack.c.bf16 %v74_v2, %v73_v1 }
  0x16   :  { %2056 = vmatmul.msk.bf16.vlgmr.msra.gmra.mxu0 %vm91_vm0, %v77_v3 }
  0x17   :  { %31 = vsyncpa [#allocation7], 0  ;;  %v75_v4 = vld [vmem:[%s3412_s20 + $0x10] sm:$0xff]  ;;  %v76_v5 = vld [vmem:[%s3412_s20 + $0x18] sm:$0xff]  ;;  %s3413_s5 = sld [smem:[#allocation10_spill]]  ;;  %vm119_vm1 = vcmask 257024  }
  0x18   :  { %v78_v6 = vpack.c.bf16 %v76_v5, %v75_v4  ;;  %s3414_s30 = sld [smem:[#allocation17_spill]]  ;;  %vm122_vm2 = vcmask 261120   ;;  %v2261_v12 = vld [vmem:[%s3378_s10 + $0x8] sm:$0xff]  ;;  %v2260_v13 = vld [vmem:[%s3378_s10] sm:$0xff]  ;;  %s2462_s26 = smov 120   ;;  %vm324_vm3 = vcmask 64512  }
  0x19   :  { %207 = vmatpush.bf16.msra.mxu1 %v2261_v12  ;;  %s3415_s27 = sld [smem:[#allocation18_spill]]  ;;  %v2263_v59 = vld [vmem:[%s3380_s12 + $0x8] sm:$0xff]  ;;  %v2262_v60 = vld [vmem:[%s3380_s12] sm:$0xff]  ;;  %s2463_s2 = smov 96   ;;  %vm389_vm4 = vcmask 195584   ;;  %vm632_vm5 = vcmask 130112  }
  0x1a   :  { %248 = vmatpush.bf16.msra.mxu3 %v2263_v59  ;;  %s3417_s3 = sld [smem:[#allocation14_spill]]  ;;  %v2363_v1 = vld [vmem:[%s3379_s11] ss:$0 sm:$0xff]  ;;  %s2464_s6 = smov 64   ;;  %vm801_vm6 = vcmask 195712   ;;  %vm970_vm7 = vcmask 261312  }
  0x1b   :  { %s3419_s8 = sld [smem:[#allocation15_spill]]  ;;  %s2466_s0 = smov 104   ;;  %vm1090_vm8 = vcmask 523264  }
  0x1c   :  { %s2469_s4 = smov 16   ;;  %s2471_s10 = smov 128  }
  0x1d   :  { %v117_v7 = vld [vmem:[%s3413_s5] sm:$0xf]  ;;  %v118_v8 = vld [vmem:[%s3413_s5 + $0x4] sm:$0xf]  ;;  %208 = vmatpush.bf16.msra.mxu1 %v2260_v13 }
  0x1e   :  { %120 = vst.msk [vmem:[#allocation2 + $0x4] sm:$0xf] %vm119_vm1, %v117_v7  ;;  %v2362_v9 = vld [vmem:[%s3414_s30] ss:$0 sm:$0xff]  ;;  %249 = vmatpush.bf16.msra.mxu3 %v2262_v60  ;;  %s3416_s30 = sld [smem:[#allocation12_spill]] }
  0x1f   :  { %121 = vst.msk [vmem:[#allocation2 + $0x1c] sm:$0xf] %vm119_vm1, %v118_v8  ;;  %v131_v19 = vld [vmem:[%s3415_s27] sm:$0x1f]  ;;  %s2468_s27 = smov 24  }
  0x20   :  { %v136_v20 = vperm.slane %v131_v19, 0  ;;  %v143_v21 = vperm.slane %v131_v19, 1  ;;  %v152_v28 = vperm.slane %v131_v19, 2  ;;  %v161_v32 = vperm.slane %v131_v19, 3  ;;  %v1159_v62 = vld [vmem:[%s3417_s3 + $0x8] sm:$0xff]  ;;  %v1158_v7 = vld [vmem:[%s3417_s3] sm:$0xff] }
  0x21   :  { %v170_v42 = vperm.slane %v131_v19, 4 }
  0x24   :  { %v259_v61 = vld [vmem:[%s3416_s30 + $0x8] sm:$0xff] }
  0x25   :  { %263 = vst.msk [vmem:[#allocation3 + $0x8] sm:$0xff] %vm122_vm2, %v259_v61 }
  0x26   :  { %2057 = vmatmul.msk.bf16.gmra.mxu0 %vm91_vm0, %v78_v6  ;;  %v258_v6 = vld [vmem:[%s3416_s30] sm:$0xff] }
  0x27   :  { %262 = vst.msk [vmem:[#allocation3] sm:$0xff] %vm122_vm2, %v258_v6 }
  0x2c   :  { %v2663_v63 = vld [vmem:[#allocation3 + $0x8] sm:$0xff] }
  0x2d   :  { %464 = vrot.lane.b32.xlu2 %v2663_v63, %s2462_s26  ;;  %1163 = vst.msk [vmem:[#allocation3 + $0x8] sm:$0xff] %vm122_vm2, %v1159_v62 }
  0x2e   :  { %296 = vst.msk [vmem:[%s3390_s22] sm:$0xff] %vm122_vm2, %v2663_v63 }
  0x34   :  { %v2690_v8 = vld [vmem:[#allocation3 + $0x8] sm:$0xff] }
  0x35   :  { %1196 = vst.msk [vmem:[%s3392_s24] sm:$0xff] %vm122_vm2, %v2690_v8 }
  0x3c   :  { %v1161_v19 = vld [vmem:[%s3417_s3 + $0x18] sm:$0xff] }
  0x93   :  { %v107_v10 = vpop.f32.mrf.mxu0 }
  0x94   :  { %v108_v11 = vadd.f32 %v2362_v9, %v107_v10  ;;  %v2364_v10 = vld [vmem:[%s3381_s13] ss:$0 sm:$0xff] }
  0x96   :  { %123 = vst.msk [vmem:[#allocation2 + $0x8] sm:$0xff] %vm122_vm2, %v108_v11 }
  0x9b   :  { %v109_v14 = vpop.f32.mrf.mxu0 }
  0x9c   :  { %v110_v15 = vadd.f32 %v2362_v9, %v109_v14 }
  0x9e   :  { %124 = vst.msk [vmem:[#allocation2 + $0x10] sm:$0xff] %vm122_vm2, %v110_v15 }
  0xa3   :  { %v112_v16 = vpop.f32.mrf.mxu0 }
  0xa4   :  { %v113_v17 = vadd.f32 %v2362_v9, %v112_v16  ;;  %v261_v16 = vld [vmem:[%s3416_s30 + $0x18] sm:$0xff] }
  0xa5   :  { %v127_v18 = vld [vmem:[#allocation2 + $0x14] sm:$0xf]  ;;  %v133_v22 = vld [vmem:[#allocation2 + $0x5] ss:$2 sm:$0xff]  ;;  %265 = vst.msk [vmem:[#allocation3 + $0x20] sm:$0xff] %vm122_vm2, %v261_v16 }
  0xa6   :  { %129 = vst.msk [vmem:[%s3389_s21] sm:$0xf] %vm119_vm1, %v127_v18  ;;  %v140_v23 = vld [vmem:[#allocation2 + $0x6] ss:$2 sm:$0xff]  ;;  %v137_v26 = vmul.f32 %v136_v20, %v133_v22  ;;  %v149_v29 = vld [vmem:[#allocation2 + $0x7] ss:$2 sm:$0xff]  ;;  %v2723_v18 = vpop.permute.xlu2 %464 }
  0xa7   :  { %125 = vst.msk [vmem:[#allocation2 + $0x20] sm:$0xff] %vm122_vm2, %v113_v17  ;;  %v144_v27 = vmul.f32 %v143_v21, %v140_v23  ;;  %v153_v31 = vmul.f32 %v152_v28, %v149_v29  ;;  %v158_v33 = vld [vmem:[#allocation2 + $0x8] ss:$2 sm:$0xff]  ;;  %v167_v44 = vld [vmem:[#allocation2 + $0x9] ss:$2 sm:$0xff] }
  0xa8   :  { %v162_v41 = vmul.f32 %v161_v32, %v158_v33  ;;  %v171_v51 = vmul.f32 %v170_v42, %v167_v44  ;;  %v260_v17 = vld [vmem:[%s3416_s30 + $0x10] sm:$0xff]  ;;  %v1177_v29 = vld [vmem:[%s3419_s8 + $0x8] sm:$0xff]  ;;  %s2470_s30 = smov [#allocation6]  }
  0xa9   :  { %v146_v30 = vadd.f32 %v144_v27, %v137_v26  ;;  %264 = vst.msk [vmem:[#allocation3 + $0x18] sm:$0xff] %vm122_vm2, %v260_v17 }
  0xab   :  { %v114_v24 = vpop.f32.mrf.mxu0  ;;  %v155_v34 = vadd.f32 %v153_v31, %v146_v30 }
  0xac   :  { %v115_v25 = vadd.f32 %v2362_v9, %v114_v24  ;;  %v2692_v9 = vld [vmem:[#allocation3] sm:$0xff] }
  0xad   :  { %v164_v47 = vadd.f32 %v162_v41, %v155_v34  ;;  %462 = vrot.lane.b32.xlu2 %v2692_v9, %s2462_s26  ;;  %1162 = vst.msk [vmem:[#allocation3] sm:$0xff] %vm122_vm2, %v1158_v7 }
  0xae   :  { %126 = vst.msk [vmem:[#allocation2 + $0x28] sm:$0xff] %vm122_vm2, %v115_v25 }
  0xaf   :  { %v173_v54 = vadd.f32 %v171_v51, %v164_v47 }
  0xb0   :  { %v2741_v22 = vld [vmem:[#allocation3 + $0x18] sm:$0xff] }
  0xb1   :  { %v175_v56 = vmax.f32 %v173_v54, 0.0 }
  0xb5   :  { %v128_v35 = vld [vmem:[#allocation2 + $0x2c] sm:$0xf]  ;;  %v135_v36 = vld [vmem:[#allocation2 + $0x1d] ss:$2 sm:$0xff] }
  0xb6   :  { %v142_v37 = vld [vmem:[#allocation2 + $0x1e] ss:$2 sm:$0xff]  ;;  %130 = vst.msk [vmem:[%s3389_s21 + $0x4] sm:$0xf] %vm119_vm1, %v128_v35  ;;  %v138_v38 = vmul.f32 %v136_v20, %v135_v36  ;;  %v151_v40 = vld [vmem:[#allocation2 + $0x1f] ss:$2 sm:$0xff] }
  0xb7   :  { %v145_v39 = vmul.f32 %v143_v21, %v142_v37  ;;  %v160_v43 = vld [vmem:[#allocation2 + $0x20] ss:$2 sm:$0xff]  ;;  %v154_v46 = vmul.f32 %v152_v28, %v151_v40  ;;  %v169_v48 = vld [vmem:[#allocation2 + $0x21] ss:$2 sm:$0xff]  ;;  %v2728_v20 = vld [vmem:[#allocation3 + $0x20] sm:$0xff]  ;;  %s3420_s21 = sld [smem:[#allocation11_spill]] }
  0xb8   :  { %v163_v50 = vmul.f32 %v161_v32, %v160_v43  ;;  %v172_v53 = vmul.f32 %v170_v42, %v169_v48  ;;  %1165 = vst.msk [vmem:[#allocation3 + $0x20] sm:$0xff] %vm122_vm2, %v1161_v19  ;;  %v1160_v21 = vld [vmem:[%s3417_s3 + $0x10] sm:$0xff]  ;;  %s3418_s3 = sld [smem:[#allocation13_spill]]  ;;  %v1176_v32 = vld [vmem:[%s3419_s8] sm:$0xff] }
  0xb9   :  { %v147_v45 = vadd.f32 %v145_v39, %v138_v38  ;;  %298 = vst.msk [vmem:[%s3390_s22 + $0x10] sm:$0xff] %vm122_vm2, %v2728_v20 }
  0xba   :  { %1164 = vst.msk [vmem:[#allocation3 + $0x18] sm:$0xff] %vm122_vm2, %v1160_v21 }
  0xbb   :  { %v156_v49 = vadd.f32 %v154_v46, %v147_v45 }
  0xbd   :  { %v165_v52 = vadd.f32 %v163_v50, %v156_v49 }
  0xbe   :  { %v277_v25 = vld [vmem:[%s3418_s3 + $0x8] sm:$0xff]  ;;  %v278_v26 = vld [vmem:[%s3418_s3 + $0x10] sm:$0xff]  ;;  %v276_v30 = vld [vmem:[%s3418_s3] sm:$0xff] }
  0xbf   :  { %v174_v55 = vadd.f32 %v172_v53, %v165_v52  ;;  %v2746_v24 = vld [vmem:[#allocation3 + $0x20] sm:$0xff]  ;;  %281 = vst.msk [vmem:[#allocation4 + $0x8] sm:$0xff] %vm122_vm2, %v277_v25 }
  0xc0   :  { %1198 = vst.msk [vmem:[%s3392_s24 + $0x10] sm:$0xff] %vm122_vm2, %v2746_v24 }
  0xc1   :  { %v176_v57 = vmax.f32 %v174_v55, 0.0  ;;  %282 = vst.msk [vmem:[#allocation4 + $0x18] sm:$0xff] %vm122_vm2, %v278_v26  ;;  %v215_v55 = vld [vmem:[%s3420_s21] sm:$0x3] }
  0xc2   :  { %280 = vst.msk [vmem:[#allocation4] sm:$0xff] %vm122_vm2, %v276_v30  ;;  %v217_v60 = vrot.slane %v215_v55, 1 }
  0xc3   :  { %v177_v58 = vpack.c.bf16 %v176_v57, %v175_v56  ;;  %v2879_v56 = vperm.slane %v215_v55, 0 }
  0xc4   :  { %v2893_v61 = vperm.slane %v217_v60, 0 }
  0xc5   :  { %2066 = vmatmul.msk.bf16.vlgmr.msra.gmra.mxu1 %vm122_vm2, %v177_v58 }
  0xc6   :  { %v2764_v28 = vld [vmem:[#allocation4 + $0x8] sm:$0xff] }
  0xc7   :  { %1181 = vst.msk [vmem:[#allocation4 + $0x8] sm:$0xff] %vm122_vm2, %v1177_v29 }
  0xc8   :  { %304 = vst.msk [vmem:[%s3391_s23] sm:$0xff] %vm122_vm2, %v2764_v28  ;;  %v2873_v54 = vld [vmem:[#allocation4 + $0x18] sm:$0xff] }
  0xc9   :  { %v2800_v34 = vld [vmem:[#allocation4] sm:$0xff] }
  0xca   :  { %1180 = vst.msk [vmem:[#allocation4] sm:$0xff] %vm122_vm2, %v1176_v32 }
  0xce   :  { %v2793_v33 = vld [vmem:[#allocation4 + $0x8] sm:$0xff] }
  0xcf   :  { %1204 = vst.msk [vmem:[%s3393_s25] sm:$0xff] %vm122_vm2, %v2793_v33 }
 0x107   :  { %v2744_v23 = vpop.permute.xlu2 %462 }
 0x142   :  { %v210_v0 = vpop.f32.mrf.mxu1 }
 0x143   :  { %v2671_v3 = vadd.f32 %v2363_v1, %v210_v0 }
 0x14a   :  { %v212_v2 = vpop.f32.mrf.mxu1 }
 0x14b   :  { %v2673_v4 = vadd.f32 %v2363_v1, %v212_v2 }
 0x14d   :  { %v218_v5 = vpack.c.bf16 %v2673_v4, %v2671_v3 }
 0x14f   :  { %2075 = vmatmul.msk.bf16.vlgmr.msra.gmra.mxu3 %vm122_vm2, %v218_v5 }
 0x1d2   :  { %v251_v11 = vpop.f32.mrf.mxu3 }
 0x1d3   :  { %v252_v12 = vadd.f32 %v2364_v10, %v251_v11  ;;  %v1179_v11 = vld [vmem:[%s3419_s8 + $0x18] sm:$0xff] }
 0x1d5   :  { %268 = vrot.lane.b32.xlu0 %v252_v12, %s2463_s2  ;;  %v2711_v15 = vmul.f32 0.35355338, %v252_v12 }
 0x1da   :  { %v253_v13 = vpop.f32.mrf.mxu3 }
 0x1db   :  { %v2706_v14 = vadd.f32 %v2364_v10, %v253_v13 }
 0x1dd   :  { %270 = vrot.lane.b32.xlu2 %v2706_v14, %s2463_s2  ;;  %284 = vrot.lane.b32.xlu0 %v252_v12, %s2464_s6  ;;  %v2809_v36 = vmul.f32 0.35355338, %v2706_v14 }
 0x1e5   :  { %460 = vrot.lane.b32.xlu0 %v2711_v15, %s2462_s26  ;;  %500 = vrot.lane.b32.xlu2 %v2728_v20, %s2462_s26 }
 0x1ed   :  { %498 = vrot.lane.b32.xlu2 %v2741_v22, %s2462_s26 }
 0x237   :  { %v271_v27 = vpop.permute.xlu2 %270 }
 0x238   :  { %275 = vst.msk [vmem:[#allocation3 + $0x28] sm:$0xff] %vm122_vm2, %v271_v27 }
 0x23f   :  { %v2779_v31 = vld [vmem:[#allocation3 + $0x28] sm:$0xff]  ;;  %v501_v41 = vpop.permute.xlu2 %500 }
 0x240   :  { %2080 = vmatpush.xpose.msk.msrb.mxu1 %vm324_vm3, %v2779_v31  ;;  %502 = vrot.lane.b32.xlu0 %v2779_v31, %s2462_s26  ;;  %299 = vst.msk [vmem:[%s3390_s22 + $0x18] sm:$0xff] %vm122_vm2, %v2779_v31 }
 0x244   :  { %2081 = vmatpush.xpose.msk.msrb.mxu1 %vm324_vm3, %v2728_v20 }
 0x247   :  { %v269_v35 = vpop.permute.xlu0 %268  ;;  %v499_v43 = vpop.permute.xlu2 %498 }
 0x248   :  { %274 = vst.msk [vmem:[#allocation3 + $0x10] sm:$0xff] %vm122_vm2, %v269_v35  ;;  %2082 = vmatpush.xpose.msk.msrb.mxu1 %vm324_vm3, %v2741_v22 }
 0x24b   :  { %2083 = vmatmul.msk.f32.vlgmr.msrb.gmra.mxu1 %vm324_vm3, %v2809_v36 }
 0x24f   :  { %v285_v37 = vpop.permute.xlu0 %284  ;;  %v2813_v38 = vld [vmem:[#allocation3 + $0x10] sm:$0xff] }
 0x250   :  { %290 = vst.msk [vmem:[#allocation4 + $0x10] sm:$0xff] %vm122_vm2, %v285_v37  ;;  %2076 = vmatpush.xpose.msk.msrb.mxu3 %vm324_vm3, %v2813_v38 }
 0x251   :  { %297 = vst.msk [vmem:[%s3390_s22 + $0x8] sm:$0xff] %vm122_vm2, %v2813_v38  ;;  %s2465_s22 = smov 112  }
 0x254   :  { %2077 = vmatpush.xpose.msk.msrb.mxu3 %vm324_vm3, %v2663_v63 }
 0x257   :  { %v2825_v39 = vld [vmem:[#allocation4 + $0x10] sm:$0xff]  ;;  %v2851_v42 = vpop.permute.xlu0 %460 }
 0x258   :  { %2078 = vmatpush.xpose.msk.msrb.mxu3 %vm324_vm3, %v2692_v9  ;;  %v2831_v40 = vpack.i.bf16 %v2764_v28, %v2825_v39  ;;  %305 = vst.msk [vmem:[%s3391_s23 + $0x8] sm:$0xff] %vm122_vm2, %v2825_v39 }
 0x25a   :  { %2293 = vrot.lane.b32.xlu2 %v2831_v40, %s2462_s26 }
 0x25b   :  { %2079 = vmatmul.msk.f32.vlgmr.msrb.gmra.mxu3 %vm324_vm3, %v2711_v15 }
 0x25c   :  { %424 = vmatpush.msra.mxu3 %v2825_v39 }
 0x25e   :  { %425 = vmatpush.msra.mxu3 %v2764_v28 }
 0x25f   :  { %v279_v44 = vld [vmem:[%s3418_s3 + $0x18] sm:$0xff] }
 0x260   :  { %426 = vmatpush.msra.mxu3 %v2800_v34  ;;  %283 = vst.msk [vmem:[#allocation4 + $0x20] sm:$0xff] %vm122_vm2, %v279_v44 }
 0x262   :  { %553 = vrot.lane.b32.xlu2 %v2800_v34, %s2462_s26 }
 0x267   :  { %v2858_v48 = vld [vmem:[#allocation4 + $0x20] sm:$0xff] }
 0x268   :  { %306 = vst.msk [vmem:[%s3391_s23 + $0x10] sm:$0xff] %vm122_vm2, %v2858_v48 }
 0x269   :  { %1183 = vst.msk [vmem:[#allocation4 + $0x20] sm:$0xff] %vm122_vm2, %v1179_v11 }
 0x26a   :  { %637 = vrot.lane.b32.xlu2 %v2692_v9, %s2465_s22 }
 0x272   :  { %286 = vrot.lane.b32.xlu2 %v2706_v14, %s2464_s6 }
 0x2b2   :  { %v503_v45 = vpop.permute.xlu0 %502 }
 0x2b3   :  { %2090 = vmatpush.xpose.msk.msrb.mxu0 %vm324_vm3, %v503_v45 }
 0x2b4   :  { %v2294_v46 = vpop.permute.xlu2 %2293 }
 0x2b5   :  { %v2295_v47 = vunpack.i.l.bf16 %v2294_v46  ;;  %v2296_v49 = vunpack.i.h.bf16 %v2294_v46 }
 0x2b7   :  { %578 = vmatpush.msra.mxu1 %v2295_v47  ;;  %2091 = vmatpush.xpose.msk.msrb.mxu0 %vm324_vm3, %v501_v41 }
 0x2b9   :  { %579 = vmatpush.msra.mxu1 %v2296_v49 }
 0x2bb   :  { %2092 = vmatpush.xpose.msk.msrb.mxu0 %vm324_vm3, %v499_v43 }
 0x2bc   :  { %v554_v50 = vpop.permute.xlu2 %553 }
 0x2bd   :  { %580 = vmatpush.msra.mxu1 %v554_v50 }
 0x2c4   :  { %v638_v51 = vpop.permute.xlu2 %637 }
 0x2c8   :  { %v386_v62 = vpop.f32.mrf.mxu1 }
 0x2c9   :  { %v387_v0 = vadd.f32 %v386_v62, %v2893_v61 }
 0x2cb   :  { %v393_v1 = vsel %vm389_vm4, %v387_v0, -inf }
 0x2cc   :  { %v287_v52 = vpop.permute.xlu2 %286 }
 0x2cd   :  { %291 = vst.msk [vmem:[#allocation4 + $0x28] sm:$0xff] %vm122_vm2, %v287_v52 }
 0x2d4   :  { %v319_v53 = vld [vmem:[#allocation4 + $0x28] sm:$0xff] }
 0x2d5   :  { %447 = vmatpush.msra.mxu2 %v319_v53  ;;  %307 = vst.msk [vmem:[%s3391_s23 + $0x18] sm:$0xff] %vm122_vm2, %v319_v53  ;;  %v2929_v16 = vpack.i.bf16 %v2858_v48, %v319_v53 }
 0x2d7   :  { %448 = vmatpush.msra.mxu2 %v2858_v48 }
 0x2d9   :  { %449 = vmatpush.msra.mxu2 %v2873_v54 }
 0x2de   :  { %v354_v57 = vpop.f32.mrf.mxu3 }
 0x2df   :  { %v355_v58 = vadd.f32 %v354_v57, %v2879_v56 }
 0x2e1   :  { %v390_v59 = vsel %vm389_vm4, %v355_v58, -inf }
 0x2e2   :  { %391 = vmax.xlane.f32.xlu1 %v390_v59 }
 0x2fb   :  { %466 = vrot.lane.b32.xlu1 %v2813_v38, %s2462_s26 }
 0x303   :  { %496 = vrot.lane.b32.xlu1 %v2809_v36, %s2462_s26 }
 0x30b   :  { %641 = vrot.lane.b32.xlu1 %v2813_v38, %s2465_s22 }
 0x313   :  { %639 = vrot.lane.b32.xlu1 %v2663_v63, %s2465_s22 }
 0x31b   :  { %635 = vrot.lane.b32.xlu1 %v2711_v15, %s2465_s22 }
 0x345   :  { %394 = vmax.xlane.f32.xlu1 %v393_v1 }
 0x355   :  { %v392_v2 = vpop.xlane.xlu1 %391 }
 0x356   :  { %v396_v5 = vsub.f32 %v355_v58, %v392_v2 }
 0x358   :  { %v398_v6 = vmul.f32 1.442695, %v396_v5 }
 0x35a   :  { %2372 = vpow2.f32 %v398_v6 }
 0x35e   :  { %675 = vrot.lane.b32.xlu1 %v2728_v20, %s2465_s22 }
 0x360   :  { %v2899_v7 = vpop.eup %2372 }
 0x361   :  { %2084 = vmatmul.msk.f32.vlgmr.msra.gmra.mxu3 %vm389_vm4, %v2899_v7 }
 0x366   :  { %671 = vrot.lane.b32.xlu1 %v2809_v36, %s2465_s22 }
 0x36d   :  { %v467_v10 = vpop.permute.xlu1 %466 }
 0x36e   :  { %810 = vrot.lane.b32.xlu1 %v2813_v38, %s2466_s0  ;;  %2086 = vmatpush.xpose.msk.msrb.mxu3 %vm324_vm3, %v467_v10 }
 0x372   :  { %2087 = vmatpush.xpose.msk.msrb.mxu3 %vm324_vm3, %v2723_v18 }
 0x375   :  { %v497_v12 = vpop.permute.xlu1 %496 }
 0x376   :  { %725 = vrot.lane.b32.xlu1 %v2800_v34, %s2465_s22  ;;  %2088 = vmatpush.xpose.msk.msrb.mxu3 %vm324_vm3, %v2744_v23 }
 0x377   :  { %2093 = vmatmul.msk.f32.vlgmr.msrb.gmra.mxu0 %vm324_vm3, %v497_v12 }
 0x379   :  { %2089 = vmatmul.msk.f32.vlgmr.msrb.gmra.mxu3 %vm324_vm3, %v2851_v42 }
 0x37d   :  { %v642_v13 = vpop.permute.xlu1 %641 }
 0x37e   :  { %806 = vrot.lane.b32.xlu1 %v2692_v9, %s2466_s0  ;;  %2096 = vmatpush.xpose.msk.msrb.mxu1 %vm324_vm3, %v642_v13  ;;  %v1178_v9 = vld [vmem:[%s3419_s8 + $0x10] sm:$0xff]  ;;  %s2467_s8 = smov 8  }
 0x37f   :  { %1182 = vst.msk [vmem:[#allocation4 + $0x18] sm:$0xff] %vm122_vm2, %v1178_v9 }
 0x385   :  { %v640_v14 = vpop.permute.xlu1 %639 }
 0x386   :  { %804 = vrot.lane.b32.xlu1 %v2711_v15, %s2466_s0  ;;  %2097 = vmatpush.xpose.msk.msrb.mxu1 %vm324_vm3, %v640_v14  ;;  %v2939_v15 = vld [vmem:[#allocation4 + $0x20] sm:$0xff] }
 0x387   :  { %1206 = vst.msk [vmem:[%s3393_s25 + $0x10] sm:$0xff] %vm122_vm2, %v2939_v15 }
 0x38a   :  { %2098 = vmatpush.xpose.msk.msrb.mxu1 %vm324_vm3, %v638_v51 }
 0x38d   :  { %v636_v17 = vpop.permute.xlu1 %635 }
 0x38e   :  { %2308 = vrot.lane.b32.xlu1 %v2929_v16, %s2465_s22 }
 0x396   :  { %757 = vrot.lane.b32.xlu1 %v2873_v54, %s2465_s22 }
 0x3b8   :  { %v395_v18 = vpop.xlane.xlu1 %394 }
 0x3b9   :  { %v397_v19 = vsub.f32 %v387_v0, %v395_v18  ;;  %v2317_v18 = vpack.i.bf16 %v2825_v39, %v2873_v54 }
 0x3bb   :  { %v400_v21 = vmul.f32 1.442695, %v397_v19 }
 0x3bd   :  { %2374 = vpow2.f32 %v400_v21 }
 0x3c3   :  { %v2946_v23 = vpop.eup %2374 }
 0x3c4   :  { %2085 = vmatmul.msk.f32.vlgmr.msra.gmra.mxu2 %vm389_vm4, %v2946_v23 }
 0x3d0   :  { %v676_v37 = vpop.permute.xlu1 %675 }
 0x3d8   :  { %v672_v38 = vpop.permute.xlu1 %671 }
 0x3e0   :  { %v811_v44 = vpop.permute.xlu1 %810 }
 0x3e4   :  { %v2950_v25 = vpop.f32.mrf.mxu3 }
 0x3e8   :  { %v726_v48 = vpop.permute.xlu1 %725 }
 0x3f0   :  { %v807_v50 = vpop.permute.xlu1 %806 }
 0x3f4   :  { %v529_v26 = vpop.f32.mrf.mxu0 }
 0x3f5   :  { %v530_v27 = vadd.f32 %v529_v26, %v2893_v61 }
 0x3f7   :  { %v535_v29 = vsel %vm389_vm4, %v530_v27, -inf }
 0x3f8   :  { %536 = vmax.xlane.f32.xlu2 %v535_v29  ;;  %v805_v58 = vpop.permute.xlu1 %804  ;;  %v402_v29 = vsel %vm389_vm4, %v2899_v7, 0.0 }
 0x3fc   :  { %v493_v30 = vpop.f32.mrf.mxu3 }
 0x3fd   :  { %v494_v32 = vadd.f32 %v493_v30, %v2879_v56 }
 0x3ff   :  { %v532_v35 = vsel %vm389_vm4, %v494_v32, -inf }
 0x400   :  { %533 = vmax.xlane.f32.xlu0 %v532_v35  ;;  %v2309_v1 = vpop.permute.xlu1 %2308 }
 0x401   :  { %v2310_v2 = vunpack.i.l.bf16 %v2309_v1  ;;  %v2311_v5 = vunpack.i.h.bf16 %v2309_v1 }
 0x410   :  { %673 = vrot.lane.b32.xlu2 %v2741_v22, %s2465_s22 }
 0x414   :  { %2298 = vrot.lane.b32.xlu0 %v2929_v16, %s2462_s26 }
 0x418   :  { %2303 = vrot.lane.b32.xlu2 %v2831_v40, %s2465_s22 }
 0x41c   :  { %677 = vrot.lane.b32.xlu0 %v2779_v31, %s2465_s22 }
 0x420   :  { %846 = vrot.lane.b32.xlu2 %v2779_v31, %s2466_s0 }
 0x424   :  { %588 = vrot.lane.b32.xlu0 %v2873_v54, %s2462_s26 }
 0x428   :  { %844 = vrot.lane.b32.xlu2 %v2728_v20, %s2466_s0 }
 0x430   :  { %842 = vrot.lane.b32.xlu2 %v2741_v22, %s2466_s0 }
 0x438   :  { %840 = vrot.lane.b32.xlu2 %v2809_v36, %s2466_s0 }
 0x46b   :  { %v537_v40 = vpop.xlane.xlu2 %536 }
 0x46c   :  { %v539_v51 = vsub.f32 %v530_v27, %v537_v40  ;;  %v758_v40 = vpop.permute.xlu1 %757 }
 0x46e   :  { %v542_v55 = vmul.f32 1.442695, %v539_v51  ;;  %v405_v51 = vsel %vm389_vm4, %v2946_v23, 0.0 }
 0x473   :  { %v674_v41 = vpop.permute.xlu2 %673  ;;  %v534_v42 = vpop.xlane.xlu0 %533 }
 0x474   :  { %v538_v43 = vsub.f32 %v494_v32, %v534_v42 }
 0x476   :  { %v540_v31 = vmul.f32 1.442695, %v538_v43 }
 0x478   :  { %2376 = vpow2.f32 %v540_v31 }
 0x479   :  { %2378 = vpow2.f32 %v542_v55 }
 0x47b   :  { %v2304_v45 = vpop.permute.xlu2 %2303 }
 0x47c   :  { %v2305_v46 = vunpack.i.l.bf16 %v2304_v45  ;;  %v2306_v20 = vunpack.i.h.bf16 %v2304_v45 }
 0x47e   :  { %v2974_v47 = vpop.eup %2376  ;;  %750 = vmatpush.msra.mxu3 %v2305_v46 }
 0x47f   :  { %2094 = vmatmul.msk.f32.vlgmr.msra.gmra.mxu1 %vm389_vm4, %v2974_v47  ;;  %v2379_v62 = vpop.eup %2378  ;;  %v544_v32 = vsel %vm389_vm4, %v2974_v47, 0.0 }
 0x480   :  { %751 = vmatpush.msra.mxu3 %v2306_v20 }
 0x482   :  { %752 = vmatpush.msra.mxu3 %v726_v48 }
 0x483   :  { %v847_v22 = vpop.permute.xlu2 %846 }
 0x484   :  { %2106 = vmatpush.xpose.msk.msrb.mxu3 %vm324_vm3, %v811_v44  ;;  %2110 = vmatpush.xpose.msk.msra.mxu0 %vm324_vm3, %v847_v22 }
 0x486   :  { %v2299_v36 = vpop.permute.xlu0 %2298 }
 0x487   :  { %2099 = vmatmul.msk.f32.vlgmr.msrb.gmra.mxu1 %vm324_vm3, %v636_v17  ;;  %v2300_v49 = vunpack.i.l.bf16 %v2299_v36  ;;  %v2301_v52 = vunpack.i.h.bf16 %v2299_v36  ;;  %v2997_v17 = vpop.f32.mrf.mxu2 }
 0x489   :  { %613 = vmatpush.msrb.mxu2 %v2300_v49 }
 0x48b   :  { %v845_v53 = vpop.permute.xlu2 %844  ;;  %614 = vmatpush.msrb.mxu2 %v2301_v52 }
 0x48c   :  { %2111 = vmatpush.xpose.msk.msra.mxu0 %vm324_vm3, %v845_v53 }
 0x48e   :  { %v678_v57 = vpop.permute.xlu0 %677 }
 0x493   :  { %v843_v59 = vpop.permute.xlu2 %842 }
 0x494   :  { %2112 = vmatpush.xpose.msk.msra.mxu0 %vm324_vm3, %v843_v59 }
 0x496   :  { %v589_v60 = vpop.permute.xlu0 %588 }
 0x497   :  { %615 = vmatpush.msrb.mxu2 %v589_v60 }
 0x498   :  { %2095 = vmatmul.msk.f32.vlgmr.msrb.gmra.mxu2 %vm389_vm4, %v2379_v62 }
 0x499   :  { %2100 = vmatpush.xpose.msk.msra.mxu2 %vm324_vm3, %v678_v57 }
 0x49b   :  { %v841_v0 = vpop.permute.xlu2 %840 }
 0x49c   :  { %2113 = vmatmul.msk.f32.vlgmr.msra.gmra.mxu0 %vm324_vm3, %v841_v0  ;;  %v2322_v0 = vpack.i.bf16 %v2800_v34, %v2764_v28 }
 0x49d   :  { %2101 = vmatpush.xpose.msk.msra.mxu2 %vm324_vm3, %v676_v37 }
 0x4a1   :  { %2102 = vmatpush.xpose.msk.msra.mxu2 %vm324_vm3, %v674_v41 }
 0x4a4   :  { %2103 = vmatmul.msk.f32.vlgmr.msra.gmra.mxu2 %vm324_vm3, %v672_v38 }
 0x4a5   :  { %782 = vmatpush.msrb.mxu2 %v2310_v2 }
 0x4a7   :  { %783 = vmatpush.msrb.mxu2 %v2311_v5 }
 0x4a9   :  { %784 = vmatpush.msrb.mxu2 %v758_v40 }
 0x4fc   :  { %v2989_v6 = vpop.f32.mrf.mxu1 }
 0x504   :  { %v668_v10 = vpop.f32.mrf.mxu1 }
 0x505   :  { %v669_v11 = vadd.f32 %v668_v10, %v2879_v56 }
 0x507   :  { %v707_v12 = vsel %vm389_vm4, %v669_v11, -inf }
 0x508   :  { %708 = vmax.xlane.f32.xlu0 %v707_v12 }
 0x519   :  { %v873_v13 = vpop.f32.mrf.mxu0 }
 0x51a   :  { %v874_v14 = vadd.f32 %v873_v13, %v2893_v61 }
 0x51b   :  { %v3002_v19 = vpop.f32.mrf.mxu2 }
 0x51c   :  { %v879_v9 = vsel %vm389_vm4, %v874_v14, -inf  ;;  %808 = vrot.lane.b32.xlu0 %v2663_v63, %s2466_s0  ;;  %v547_v63 = vsel %vm389_vm4, %v2379_v62, 0.0 }
 0x51d   :  { %880 = vmax.xlane.f32.xlu2 %v879_v9 }
 0x527   :  { %v704_v21 = vpop.f32.mrf.mxu2 }
 0x528   :  { %v705_v26 = vadd.f32 %v704_v21, %v2893_v61 }
 0x52a   :  { %v710_v27 = vsel %vm389_vm4, %v705_v26, -inf }
 0x535   :  { %2318 = vrot.lane.b32.xlu2 %v2317_v18, %s2466_s0 }
 0x546   :  { %711 = vmax.xlane.f32.xlu0 %v710_v27 }
 0x55a   :  { %2313 = vrot.lane.b32.xlu0 %v2929_v16, %s2466_s0 }
 0x55e   :  { %548 = vadd.xlane.f32.xlu2 %v547_v63 }
 0x566   :  { %403 = vadd.xlane.f32.xlu2 %v402_v29 }
 0x57b   :  { %v709_v39 = vpop.xlane.xlu0 %708 }
 0x57c   :  { %v713_v54 = vsub.f32 %v669_v11, %v709_v39 }
 0x57e   :  { %v715_v30 = vmul.f32 1.442695, %v713_v54 }
 0x580   :  { %2380 = vpow2.f32 %v715_v30 }
 0x584   :  { %545 = vadd.xlane.f32.xlu0 %v544_v32 }
 0x586   :  { %v2381_v35 = vpop.eup %2380 }
 0x587   :  { %2104 = vmatmul.msk.f32.vlgmr.msra.gmra.mxu3 %vm389_vm4, %v2381_v35  ;;  %v719_v10 = vsel %vm389_vm4, %v2381_v35, 0.0 }
 0x58e   :  { %v809_v37 = vpop.permute.xlu0 %808 }
 0x58f   :  { %2107 = vmatpush.xpose.msk.msrb.mxu3 %vm324_vm3, %v809_v37 }
 0x590   :  { %v881_v16 = vpop.xlane.xlu2 %880 }
 0x591   :  { %v883_v43 = vsub.f32 %v874_v14, %v881_v16 }
 0x593   :  { %2108 = vmatpush.xpose.msk.msrb.mxu3 %vm324_vm3, %v807_v50  ;;  %v886_v31 = vmul.f32 1.442695, %v883_v43 }
 0x596   :  { %2109 = vmatmul.msk.f32.vlgmr.msrb.gmra.mxu3 %vm324_vm3, %v805_v58 }
 0x598   :  { %v2319_v7 = vpop.permute.xlu2 %2318 }
 0x599   :  { %v2321_v38 = vunpack.i.h.bf16 %v2319_v7  ;;  %v2320_v49 = vunpack.i.l.bf16 %v2319_v7 }
 0x59b   :  { %919 = vmatpush.msra.mxu1 %v2321_v38 }
 0x5b9   :  { %v712_v41 = vpop.xlane.xlu0 %711 }
 0x5ba   :  { %v714_v42 = vsub.f32 %v705_v26, %v712_v41 }
 0x5bc   :  { %v717_v44 = vmul.f32 1.442695, %v714_v42 }
 0x5be   :  { %2382 = vpow2.f32 %v717_v44 }
 0x5bf   :  { %2384 = vpow2.f32 %v886_v31  ;;  %v2265_v31 = vld [vmem:[%s3382_s14 + $0x8] sm:$0xff] }
 0x5c4   :  { %v2383_v45 = vpop.eup %2382 }
 0x5c5   :  { %2105 = vmatmul.msk.f32.vlgmr.msrb.gmra.mxu2 %vm389_vm4, %v2383_v45  ;;  %v722_v46 = vsel %vm389_vm4, %v2383_v45, 0.0  ;;  %v2385_v47 = vpop.eup %2384  ;;  %v2264_v45 = vld [vmem:[%s3382_s14] sm:$0xff] }
 0x5c6   :  { %723 = vadd.xlane.f32.xlu0 %v722_v46  ;;  %v891_v22 = vsel %vm389_vm4, %v2385_v47, 0.0 }
 0x5cc   :  { %v2314_v20 = vpop.permute.xlu0 %2313 }
 0x5cd   :  { %v2315_v48 = vunpack.i.l.bf16 %v2314_v20  ;;  %v2316_v36 = vunpack.i.h.bf16 %v2314_v20 }
 0x5ce   :  { %892 = vadd.xlane.f32.xlu0 %v891_v22  ;;  %v2267_v22 = vld [vmem:[%s3384_s16 + $0x8] sm:$0xff] }
 0x5cf   :  { %951 = vmatpush.msra.mxu2 %v2315_v48 }
 0x5d1   :  { %v549_v50 = vpop.xlane.xlu2 %548  ;;  %952 = vmatpush.msra.mxu2 %v2316_v36  ;;  %v2266_v36 = vld [vmem:[%s3384_s16] sm:$0xff] }
 0x5d3   :  { %953 = vmatpush.msra.mxu2 %v2320_v49 }
 0x5d4   :  { %2115 = vmatmul.msk.f32.vlgmr.msra.gmra.mxu2 %vm389_vm4, %v2385_v47 }
 0x5d5   :  { %1047 = vmatpush.bf16.msrb.mxu2 %v2267_v22 }
 0x5d6   :  { %406 = vadd.xlane.f32.xlu0 %v405_v51  ;;  %v2365_v51 = vld [vmem:[%s3383_s15] ss:$0 sm:$0xff] }
 0x5d9   :  { %v404_v52 = vpop.xlane.xlu2 %403  ;;  %1048 = vmatpush.bf16.msrb.mxu2 %v2266_v36 }
 0x5da   :  { %2386 = vrcp.f32 %v404_v52 }
 0x5e0   :  { %v2387_v53 = vpop.eup %2386 }
 0x5e1   :  { %v456_v55 = vmul.f32 %v2387_v53, %v2950_v25 }
 0x5e3   :  { %458 = vst.msk [vmem:[#allocation5] sm:$0xff] %vm324_vm3, %v456_v55 }
 0x5f7   :  { %v546_v62 = vpop.xlane.xlu0 %545 }
 0x60a   :  { %v754_v57 = vpop.f32.mrf.mxu3 }
 0x619   :  { %v837_v58 = vpop.f32.mrf.mxu3 }
 0x61a   :  { %v838_v59 = vadd.f32 %v837_v58, %v2879_v56 }
 0x61c   :  { %v876_v60 = vsel %vm389_vm4, %v838_v59, -inf }
 0x61d   :  { %877 = vmax.xlane.f32.xlu1 %v876_v60  ;;  %v2269_v60 = vld [vmem:[%s3386_s18 + $0x8] sm:$0xff] }
 0x636   :  { %2323 = vrot.lane.b32.xlu1 %v2322_v0, %s2466_s0  ;;  %v2366_v0 = vld [vmem:[%s3385_s17] ss:$0 sm:$0xff] }
 0x639   :  { %v724_v23 = vpop.xlane.xlu0 %723 }
 0x641   :  { %v893_v1 = vpop.xlane.xlu0 %892 }
 0x648   :  { %v786_v26 = vpop.f32.mrf.mxu2 }
 0x649   :  { %v407_v2 = vpop.xlane.xlu0 %406 }
 0x64a   :  { %2388 = vrcp.f32 %v407_v2 }
 0x64b   :  { %2390 = vrcp.f32 %v546_v62 }
 0x650   :  { %v2389_v25 = vpop.eup %2388 }
 0x651   :  { %v457_v5 = vmul.f32 %v2389_v25, %v2997_v17  ;;  %v2391_v11 = vpop.eup %2390 }
 0x652   :  { %v622_v12 = vmul.f32 %v2391_v11, %v2989_v6  ;;  %v2273_v11 = vld [vmem:[%s3380_s12 + $0x18] sm:$0xff] }
 0x653   :  { %459 = vst.msk [vmem:[#allocation5 + $0x8] sm:$0xff] %vm324_vm3, %v457_v5  ;;  %1148 = vmatpush.bf16.msrb.mxu0 %v2273_v11 }
 0x657   :  { %v955_v63 = vpop.f32.mrf.mxu2 }
 0x660   :  { %720 = vadd.xlane.f32.xlu1 %v719_v10 }
 0x679   :  { %626 = vrot.lane.b32.xlu1 %v622_v12, %s2467_s8  ;;  %v2272_v12 = vld [vmem:[%s3380_s12 + $0x10] sm:$0xff] }
 0x67a   :  { %1149 = vmatpush.bf16.msrb.mxu0 %v2272_v12 }
 0x690   :  { %v878_v28 = vpop.xlane.xlu1 %877 }
 0x691   :  { %v882_v34 = vsub.f32 %v838_v59, %v878_v28  ;;  %v2271_v59 = vld [vmem:[%s3386_s18 + $0x18] sm:$0xff] }
 0x692   :  { %1098 = vmatpush.bf16.msra.mxu3 %v2271_v59 }
 0x693   :  { %v884_v13 = vmul.f32 1.442695, %v882_v34 }
 0x695   :  { %2392 = vpow2.f32 %v884_v13  ;;  %v2367_v13 = vld [vmem:[%s3387_s19] ss:$0 sm:$0xff] }
 0x696   :  { %2394 = vrcp.f32 %v549_v50 }
 0x697   :  { %2396 = vrcp.f32 %v893_v1 }
 0x69b   :  { %v2393_v14 = vpop.eup %2392 }
 0x69c   :  { %v888_v9 = vsel %vm389_vm4, %v2393_v14, 0.0  ;;  %v2395_v6 = vpop.eup %2394 }
 0x69d   :  { %889 = vadd.xlane.f32.xlu2 %v888_v9  ;;  %v623_v27 = vmul.f32 %v2395_v6, %v3002_v19  ;;  %v2397_v29 = vpop.eup %2396  ;;  %v2368_v6 = vld [vmem:[%s3381_s13 + $0x1] ss:$0 sm:$0xff] }
 0x69e   :  { %v961_v39 = vmul.f32 %v2397_v29, %v955_v63  ;;  %v1208_v29 = vld [vmem:[#allocation3] sm:$0xff] }
 0x6a8   :  { %v2324_v17 = vpop.permute.xlu1 %2323 }
 0x6a9   :  { %v2325_v18 = vunpack.i.l.bf16 %v2324_v17  ;;  %v2326_v21 = vunpack.i.h.bf16 %v2324_v17 }
 0x6ab   :  { %920 = vmatpush.msra.mxu1 %v2325_v18 }
 0x6ad   :  { %921 = vmatpush.msra.mxu1 %v2326_v21 }
 0x6ae   :  { %2114 = vmatmul.msk.f32.vlgmr.msra.gmra.mxu1 %vm389_vm4, %v2393_v14 }
 0x6af   :  { %1001 = vmatpush.bf16.msrb.mxu1 %v2265_v31 }
 0x6b3   :  { %1002 = vmatpush.bf16.msrb.mxu1 %v2264_v45 }
 0x6b5   :  { %628 = vrot.lane.b32.xlu2 %v623_v27, %s2467_s8 }
 0x6bd   :  { %966 = vrot.lane.b32.xlu2 %v961_v39, %s2468_s27 }
 0x6c5   :  { %1358 = vrot.lane.b32.xlu2 %v2690_v8, %s2462_s26 }
 0x6d3   :  { %v721_v54 = vpop.xlane.xlu1 %720 }
 0x6d4   :  { %2398 = vrcp.f32 %v721_v54 }
 0x6d5   :  { %2400 = vrcp.f32 %v724_v23 }
 0x6da   :  { %v2399_v30 = vpop.eup %2398 }
 0x6db   :  { %v791_v32 = vmul.f32 %v2399_v30, %v754_v57  ;;  %v2401_v19 = vpop.eup %2400 }
 0x6dc   :  { %v792_v35 = vmul.f32 %v2401_v19, %v786_v26  ;;  %v1211_v19 = vld [vmem:[#allocation3 + $0x18] sm:$0xff] }
 0x6dd   :  { %795 = vrot.lane.b32.xlu0 %v791_v32, %s2469_s4  ;;  %v3124_v32 = vld [vmem:[#allocation4] sm:$0xff] }
 0x6e5   :  { %797 = vrot.lane.b32.xlu0 %v792_v35, %s2469_s4 }
 0x6eb   :  { %v627_v37 = vpop.permute.xlu1 %626 }
 0x6ec   :  { %633 = vst.msk [vmem:[#allocation5] sm:$0xff] %vm632_vm5, %v627_v37 }
 0x710   :  { %v890_v16 = vpop.xlane.xlu2 %889 }
 0x711   :  { %2402 = vrcp.f32 %v890_v16 }
 0x717   :  { %v2403_v38 = vpop.eup %2402 }
 0x718   :  { %v629_v7 = vpop.permute.xlu2 %628 }
 0x719   :  { %634 = vst.msk [vmem:[#allocation5 + $0x8] sm:$0xff] %vm632_vm5, %v629_v7 }
 0x720   :  { %v967_v44 = vpop.permute.xlu2 %966 }
 0x72b   :  { %v923_v40 = vpop.f32.mrf.mxu1 }
 0x72c   :  { %v960_v41 = vmul.f32 %v2403_v38, %v923_v40 }
 0x72e   :  { %964 = vrot.lane.b32.xlu1 %v960_v41, %s2468_s27 }
 0x74f   :  { %v796_v42 = vpop.permute.xlu0 %795 }
 0x750   :  { %802 = vst.msk [vmem:[#allocation5] sm:$0xff] %vm801_vm6, %v796_v42 }
 0x757   :  { %v798_v43 = vpop.permute.xlu0 %797 }
 0x758   :  { %803 = vst.msk [vmem:[#allocation5 + $0x8] sm:$0xff] %vm801_vm6, %v798_v43 }
 0x759   :  { %972 = vst.msk [vmem:[#allocation5 + $0x8] sm:$0xff] %vm970_vm7, %v967_v44  ;;  %v1359_v44 = vpop.permute.xlu2 %1358 }
 0x760   :  { %v974_v20 = vld [vmem:[#allocation5 + $0x8] sm:$0xff] }
 0x7a0   :  { %v965_v46 = vpop.permute.xlu1 %964 }
 0x7a1   :  { %971 = vst.msk [vmem:[#allocation5] sm:$0xff] %vm970_vm7, %v965_v46 }
 0x7a8   :  { %v973_v47 = vld [vmem:[#allocation5] sm:$0xff] }
 0x7a9   :  { %v975_v48 = vpack.c.bf16 %v974_v20, %v973_v47 }
 0x7ab   :  { %2124 = vmatmul.msk.bf16.vlgmr.msrb.gmra.mxu1 %vm122_vm2, %v975_v48 }
 0x828   :  { %v1004_v49 = vpop.f32.mrf.mxu1 }
 0x829   :  { %v1009_v50 = vadd.f32 %v1004_v49, %v2671_v3  ;;  %v2270_v3 = vld [vmem:[%s3386_s18 + $0x10] sm:$0xff] }
 0x82a   :  { %1099 = vmatpush.bf16.msra.mxu3 %v2270_v3 }
 0x82b   :  { %v1015_v55 = vadd.f32 %v2365_v51, %v1009_v50 }
 0x82e   :  { %1100 = vmatpush.bf16.msra.mxu3 %v2269_v60 }
 0x830   :  { %v1006_v52 = vpop.f32.mrf.mxu1 }
 0x831   :  { %v1010_v53 = vadd.f32 %v1006_v52, %v2673_v4  ;;  %v2268_v4 = vld [vmem:[%s3386_s18] sm:$0xff] }
 0x832   :  { %1101 = vmatpush.bf16.msra.mxu3 %v2268_v4 }
 0x833   :  { %v1016_v57 = vadd.f32 %v2365_v51, %v1010_v53 }
 0x835   :  { %v1017_v58 = vpack.c.bf16 %v1016_v57, %v1015_v55 }
 0x837   :  { %2133 = vmatmul.msk.bf16.vlgmr.msrb.gmra.mxu2 %vm122_vm2, %v1017_v58 }
 0x8ba   :  { %v1050_v62 = vpop.f32.mrf.mxu2 }
 0x8bb   :  { %v1051_v23 = vadd.f32 %v2366_v0, %v1050_v62 }
 0x8bd   :  { %v1055_v25 = vmax.f32 %v1051_v23, 0.0 }
 0x8c2   :  { %v1052_v1 = vpop.f32.mrf.mxu2 }
 0x8c3   :  { %v1053_v2 = vadd.f32 %v2366_v0, %v1052_v1 }
 0x8c5   :  { %v1056_v5 = vmax.f32 %v1053_v2, 0.0 }
 0x8c7   :  { %v1057_v10 = vpack.c.bf16 %v1056_v5, %v1055_v25 }
 0x8c9   :  { %2150 = vmatmul.msk.bf16.vlgmr.msra.gmra.mxu3 %vm1090_vm8, %v1057_v10 }
 0x94c   :  { %v1103_v28 = vpop.f32.mrf.mxu3 }
 0x94d   :  { %v1108_v34 = vadd.f32 %v1103_v28, %v1015_v55 }
 0x94f   :  { %v3095_v17 = vadd.f32 %v2367_v13, %v1108_v34 }
 0x954   :  { %v1105_v14 = vpop.f32.mrf.mxu3 }
 0x955   :  { %v1109_v9 = vadd.f32 %v1105_v14, %v1016_v57 }
 0x957   :  { %v3097_v18 = vadd.f32 %v2367_v13, %v1109_v9 }
 0x959   :  { %v1116_v21 = vpack.c.bf16 %v3097_v18, %v3095_v17 }
 0x95b   :  { %2164 = vmatmul.msk.bf16.vlgmr.msrb.gmra.mxu0 %vm122_vm2, %v1116_v21 }
 0x9d8   :  { %v1151_v26 = vpop.f32.mrf.mxu0 }
 0x9d9   :  { %v1152_v27 = vadd.f32 %v2368_v6, %v1151_v26 }
 0x9db   :  { %v3105_v63 = vmul.f32 0.35355338, %v1152_v27  ;;  %1168 = vrot.lane.b32.xlu0 %v1152_v27, %s2463_s2 }
 0x9dd   :  { %1354 = vrot.lane.b32.xlu2 %v3105_v63, %s2462_s26 }
 0x9e0   :  { %v1153_v39 = vpop.f32.mrf.mxu0 }
 0x9e1   :  { %v3115_v54 = vadd.f32 %v2368_v6, %v1153_v39 }
 0x9e3   :  { %1356 = vrot.lane.b32.xlu0 %v1208_v29, %s2462_s26  ;;  %v3120_v30 = vmul.f32 0.35355338, %v3115_v54 }
 0x9e5   :  { %1528 = vrot.lane.b32.xlu2 %v3105_v63, %s2465_s22 }
 0x9eb   :  { %1532 = vrot.lane.b32.xlu0 %v2690_v8, %s2465_s22 }
 0x9ed   :  { %1392 = vrot.lane.b32.xlu2 %v1211_v19, %s2462_s26 }
 0x9f3   :  { %1170 = vrot.lane.b32.xlu0 %v3115_v54, %s2463_s2 }
 0x9f5   :  { %1618 = vrot.lane.b32.xlu2 %v3124_v32, %s2465_s22 }
 0x9fb   :  { %1390 = vrot.lane.b32.xlu0 %v3120_v30, %s2462_s26 }
 0x9fd   :  { %1566 = vrot.lane.b32.xlu2 %v1211_v19, %s2465_s22 }
 0xa03   :  { %1447 = vrot.lane.b32.xlu0 %v3124_v32, %s2462_s26 }
 0xa0b   :  { %1568 = vrot.lane.b32.xlu0 %v2746_v24, %s2465_s22 }
 0xa13   :  { %1736 = vrot.lane.b32.xlu0 %v2746_v24, %s2466_s0 }
 0xa1b   :  { %1734 = vrot.lane.b32.xlu0 %v1211_v19, %s2466_s0 }
 0xa37   :  { %v1355_v46 = vpop.permute.xlu2 %1354 }
 0xa3f   :  { %v1529_v20 = vpop.permute.xlu2 %1528 }
 0xa47   :  { %v1393_v51 = vpop.permute.xlu2 %1392 }
 0xa4d   :  { %v1169_v35 = vpop.permute.xlu0 %1168 }
 0xa4e   :  { %1174 = vst.msk [vmem:[#allocation3 + $0x10] sm:$0xff] %vm122_vm2, %v1169_v35 }
 0xa4f   :  { %v1619_v57 = vpop.permute.xlu2 %1618 }
 0xa55   :  { %v1193_v37 = vld [vmem:[#allocation3 + $0x10] sm:$0xff]  ;;  %v1357_v16 = vpop.permute.xlu0 %1356 }
 0xa56   :  { %1197 = vst.msk [vmem:[%s3392_s24 + $0x8] sm:$0xff] %vm122_vm2, %v1193_v37  ;;  %1360 = vrot.lane.b32.xlu1 %v1193_v37, %s2462_s26  ;;  %2165 = vmatpush.xpose.msk.msra.mxu1 %vm324_vm3, %v1193_v37 }
 0xa57   :  { %v1567_v58 = vpop.permute.xlu2 %1566 }
 0xa5a   :  { %2166 = vmatpush.xpose.msk.msra.mxu1 %vm324_vm3, %v2690_v8 }
 0xa5d   :  { %v1533_v7 = vpop.permute.xlu0 %1532 }
 0xa5e   :  { %1534 = vrot.lane.b32.xlu1 %v1193_v37, %s2465_s22  ;;  %2167 = vmatpush.xpose.msk.msra.mxu1 %vm324_vm3, %v1208_v29 }
 0xa61   :  { %2168 = vmatmul.msk.f32.vlgmr.msra.gmra.mxu1 %vm324_vm3, %v3105_v63 }
 0xa65   :  { %v1171_v38 = vpop.permute.xlu0 %1170 }
 0xa66   :  { %1175 = vst.msk [vmem:[#allocation3 + $0x28] sm:$0xff] %vm122_vm2, %v1171_v38  ;;  %1530 = vrot.lane.b32.xlu1 %v1208_v29, %s2465_s22  ;;  %v2352_v38 = vpack.i.bf16 %v2939_v15, %v2793_v33 }
 0xa6d   :  { %v1195_v40 = vld [vmem:[#allocation3 + $0x28] sm:$0xff]  ;;  %v1391_v41 = vpop.permute.xlu0 %1390 }
 0xa6e   :  { %1199 = vst.msk [vmem:[%s3392_s24 + $0x18] sm:$0xff] %vm122_vm2, %v1195_v40  ;;  %1184 = vrot.lane.b32.xlu1 %v1152_v27, %s2464_s6  ;;  %1396 = vrot.lane.b32.xlu0 %v1195_v40, %s2462_s26 }
 0xa6f   :  { %2169 = vmatpush.xpose.msk.msra.mxu2 %vm324_vm3, %v1195_v40 }
 0xa73   :  { %2170 = vmatpush.xpose.msk.msra.mxu2 %vm324_vm3, %v2746_v24 }
 0xa75   :  { %v3169_v42 = vpop.permute.xlu0 %1447 }
 0xa76   :  { %1394 = vrot.lane.b32.xlu1 %v2746_v24, %s2462_s26 }
 0xa77   :  { %2171 = vmatpush.xpose.msk.msra.mxu2 %vm324_vm3, %v1211_v19 }
 0xa7a   :  { %2172 = vmatmul.msk.f32.vlgmr.msra.gmra.mxu2 %vm324_vm3, %v3120_v30 }
 0xa7d   :  { %v3171_v43 = vpop.permute.xlu0 %1568 }
 0xa7e   :  { %1700 = vrot.lane.b32.xlu1 %v2690_v8, %s2466_s0 }
 0xa85   :  { %v3174_v24 = vpop.permute.xlu0 %1736 }
 0xa86   :  { %1698 = vrot.lane.b32.xlu1 %v1208_v29, %s2466_s0 }
 0xa8d   :  { %v1735_v8 = vpop.permute.xlu0 %1734 }
 0xac8   :  { %v1361_v31 = vpop.permute.xlu1 %1360 }
 0xac9   :  { %2175 = vmatpush.xpose.msk.msrb.mxu3 %vm324_vm3, %v1361_v31 }
 0xacd   :  { %2176 = vmatpush.xpose.msk.msrb.mxu3 %vm324_vm3, %v1359_v44 }
 0xad0   :  { %v1535_v45 = vpop.permute.xlu1 %1534 }
 0xad1   :  { %2177 = vmatpush.xpose.msk.msrb.mxu3 %vm324_vm3, %v1357_v16  ;;  %v3248_v16 = vld [vmem:[#allocation4 + $0x18] sm:$0xff] }
 0xad4   :  { %2178 = vmatmul.msk.f32.vlgmr.msrb.gmra.mxu3 %vm324_vm3, %v1355_v46 }
 0xad5   :  { %2185 = vmatpush.xpose.msk.msra.mxu3 %vm324_vm3, %v1535_v45 }
 0xad8   :  { %v1531_v47 = vpop.permute.xlu1 %1530 }
 0xad9   :  { %2186 = vmatpush.xpose.msk.msra.mxu3 %vm324_vm3, %v1533_v7 }
 0xadd   :  { %2187 = vmatpush.xpose.msk.msra.mxu3 %vm324_vm3, %v1531_v47 }
 0xade   :  { %v1249_v52 = vpop.f32.mrf.mxu1 }
 0xadf   :  { %v1250_v53 = vadd.f32 %v1249_v52, %v2879_v56 }
 0xae0   :  { %2188 = vmatmul.msk.f32.vlgmr.msra.gmra.mxu3 %vm324_vm3, %v1529_v20  ;;  %v1185_v48 = vpop.permute.xlu1 %1184  ;;  %v1397_v22 = vpop.permute.xlu0 %1396 }
 0xae1   :  { %1190 = vst.msk [vmem:[#allocation4 + $0x10] sm:$0xff] %vm122_vm2, %v1185_v48  ;;  %2179 = vmatpush.xpose.msk.msrb.mxu2 %vm324_vm3, %v1397_v22  ;;  %v1284_v55 = vsel %vm389_vm4, %v1250_v53, -inf }
 0xae8   :  { %v3185_v36 = vld [vmem:[#allocation4 + $0x10] sm:$0xff]  ;;  %v1395_v49 = vpop.permute.xlu1 %1394 }
 0xae9   :  { %1205 = vst.msk [vmem:[%s3393_s25 + $0x8] sm:$0xff] %vm122_vm2, %v3185_v36  ;;  %1318 = vmatpush.msra.mxu0 %v3185_v36  ;;  %2180 = vmatpush.xpose.msk.msrb.mxu2 %vm324_vm3, %v1395_v49  ;;  %v2327_v50 = vpack.i.bf16 %v2793_v33, %v3185_v36 }
 0xaeb   :  { %2328 = vrot.lane.b32.xlu1 %v2327_v50, %s2462_s26  ;;  %2333 = vrot.lane.b32.xlu2 %v2327_v50, %s2465_s22 }
 0xaec   :  { %1319 = vmatpush.msra.mxu0 %v2793_v33 }
 0xaed   :  { %2181 = vmatpush.xpose.msk.msrb.mxu2 %vm324_vm3, %v1393_v51 }
 0xaee   :  { %1320 = vmatpush.msra.mxu0 %v3124_v32 }
 0xaf0   :  { %2182 = vmatmul.msk.f32.vlgmr.msrb.gmra.mxu2 %vm324_vm3, %v1391_v41  ;;  %v1701_v4 = vpop.permute.xlu1 %1700 }
 0xaf3   :  { %1738 = vrot.lane.b32.xlu1 %v1195_v40, %s2466_s0  ;;  %1702 = vrot.lane.b32.xlu2 %v1193_v37, %s2466_s0 }
 0xaf8   :  { %v1699_v0 = vpop.permute.xlu1 %1698 }
 0xafb   :  { %1570 = vrot.lane.b32.xlu2 %v1195_v40, %s2465_s22 }
 0xafd   :  { %v1281_v13 = vpop.f32.mrf.mxu2 }
 0xb24   :  { %1285 = vmax.xlane.f32.xlu2 %v1284_v55 }
 0xb3c   :  { %1564 = vrot.lane.b32.xlu2 %v3120_v30, %s2465_s22 }
 0xb44   :  { %1186 = vrot.lane.b32.xlu2 %v3115_v54, %s2464_s6  ;;  %s2018_s6 = sshll.u32 %s2470_s30, 4  ;;  %s2019_s6 = int_to_ptr.vmem [resolvable:$true] %s2018_s6 }
 0xb45   :  { %v2334_v59 = vpop.permute.xlu2 %2333 }
 0xb46   :  { %v2335_v3 = vunpack.i.l.bf16 %v2334_v59  ;;  %v2336_v60 = vunpack.i.h.bf16 %v2334_v59 }
 0xb48   :  { %1643 = vmatpush.msra.mxu2 %v2335_v3 }
 0xb4a   :  { %1644 = vmatpush.msra.mxu2 %v2336_v60 }
 0xb4c   :  { %1645 = vmatpush.msra.mxu2 %v1619_v57 }
 0xb4d   :  { %v1703_v62 = vpop.permute.xlu2 %1702 }
 0xb4e   :  { %2195 = vmatpush.xpose.msk.msrb.mxu2 %vm324_vm3, %v1703_v62 }
 0xb52   :  { %2196 = vmatpush.xpose.msk.msrb.mxu2 %vm324_vm3, %v1701_v4 }
 0xb55   :  { %v1571_v14 = vpop.permute.xlu2 %1570 }
 0xb56   :  { %2197 = vmatpush.xpose.msk.msrb.mxu2 %vm324_vm3, %v1699_v0 }
 0xb57   :  { %v1387_v23 = vpop.f32.mrf.mxu3 }
 0xb58   :  { %v1388_v1 = vadd.f32 %v1387_v23, %v2879_v56 }
 0xb5a   :  { %v1426_v2 = vsel %vm389_vm4, %v1388_v1, -inf }
 0xb5b   :  { %1427 = vmax.xlane.f32.xlu0 %v1426_v2 }
 0xb5d   :  { %v2329_v25 = vpop.permute.xlu1 %2328 }
 0xb5e   :  { %v2330_v5 = vunpack.i.l.bf16 %v2329_v25  ;;  %v2331_v10 = vunpack.i.h.bf16 %v2329_v25 }
 0xb60   :  { %1472 = vmatpush.msrb.mxu0 %v2330_v5 }
 0xb62   :  { %1473 = vmatpush.msrb.mxu0 %v2331_v10 }
 0xb63   :  { %v1561_v11 = vpop.f32.mrf.mxu3 }
 0xb64   :  { %v1562_v12 = vadd.f32 %v1561_v11, %v2879_v56  ;;  %1474 = vmatpush.msrb.mxu0 %v3169_v42 }
 0xb65   :  { %v1739_v34 = vpop.permute.xlu1 %1738 }
 0xb66   :  { %v1600_v28 = vsel %vm389_vm4, %v1562_v12, -inf  ;;  %2199 = vmatpush.xpose.msk.msrb.mxu3 %vm324_vm3, %v1739_v34 }
 0xb67   :  { %1601 = vmax.xlane.f32.xlu1 %v1600_v28 }
 0xb6a   :  { %2200 = vmatpush.xpose.msk.msrb.mxu3 %vm324_vm3, %v3174_v24 }
 0xb6e   :  { %2201 = vmatpush.xpose.msk.msrb.mxu3 %vm324_vm3, %v1735_v8 }
 0xb6f   :  { %1732 = vrot.lane.b32.xlu0 %v3120_v30, %s2466_s0  ;;  %v1282_v30 = vadd.f32 %v1281_v13, %v2893_v61 }
 0xb73   :  { %v1423_v9 = vpop.f32.mrf.mxu2 }
 0xb74   :  { %v1424_v21 = vadd.f32 %v1423_v9, %v2893_v61 }
 0xb76   :  { %v1429_v27 = vsel %vm389_vm4, %v1424_v21, -inf }
 0xb80   :  { %1696 = vrot.lane.b32.xlu1 %v3105_v63, %s2466_s0  ;;  %v1287_v63 = vsel %vm389_vm4, %v1282_v30, -inf }
 0xb97   :  { %v1286_v6 = vpop.xlane.xlu2 %1285 }
 0xb98   :  { %v1290_v26 = vsub.f32 %v1250_v53, %v1286_v6 }
 0xb99   :  { %1430 = vmax.xlane.f32.xlu0 %v1429_v27 }
 0xb9a   :  { %v1292_v29 = vmul.f32 1.442695, %v1290_v26 }
 0xb9c   :  { %2404 = vpow2.f32 %v1292_v29 }
 0xb9f   :  { %v1565_v39 = vpop.permute.xlu2 %1564 }
 0xba2   :  { %v3229_v54 = vpop.eup %2404 }
 0xba3   :  { %2173 = vmatmul.msk.f32.vlgmr.msra.gmra.mxu0 %vm389_vm4, %v3229_v54 }
 0xba4   :  { %2189 = vmatpush.xpose.msk.msra.mxu0 %vm324_vm3, %v1571_v14 }
 0xba7   :  { %v1187_v19 = vpop.permute.xlu2 %1186 }
 0xba8   :  { %2190 = vmatpush.xpose.msk.msra.mxu0 %vm324_vm3, %v3171_v43  ;;  %1191 = vst.msk [vmem:[#allocation4 + $0x28] sm:$0xff] %vm122_vm2, %v1187_v19  ;;  %v2357_v43 = vpack.i.bf16 %v3248_v16, %v3124_v32 }
 0xbaa   :  { %1288 = vmax.xlane.f32.xlu1 %v1287_v63 }
 0xbac   :  { %2191 = vmatpush.xpose.msk.msra.mxu0 %vm324_vm3, %v1567_v58 }
 0xbaf   :  { %v1203_v35 = vld [vmem:[#allocation4 + $0x28] sm:$0xff] }
 0xbb0   :  { %1207 = vst.msk [vmem:[%s3393_s25 + $0x18] sm:$0xff] %vm122_vm2, %v1203_v35  ;;  %1341 = vmatpush.msrb.mxu1 %v1203_v35  ;;  %v2342_v37 = vpack.i.bf16 %v2939_v15, %v1203_v35  ;;  %v2347_v7 = vpack.i.bf16 %v1203_v35, %v3185_v36 }
 0xbb2   :  { %2343 = vrot.lane.b32.xlu0 %v2342_v37, %s2465_s22  ;;  %2338 = vrot.lane.b32.xlu2 %v2342_v37, %s2462_s26 }
 0xbb3   :  { %1342 = vmatpush.msrb.mxu1 %v2939_v15 }
 0xbb5   :  { %1343 = vmatpush.msrb.mxu1 %v3248_v16 }
 0xbc3   :  { %1482 = vrot.lane.b32.xlu1 %v3248_v16, %s2462_s26 }
 0xbcb   :  { %2348 = vrot.lane.b32.xlu1 %v2347_v7, %s2466_s0 }
 0xbce   :  { %v1428_v40 = vpop.xlane.xlu0 %1427 }
 0xbcf   :  { %v1432_v41 = vsub.f32 %v1388_v1, %v1428_v40 }
 0xbd1   :  { %v1434_v42 = vmul.f32 1.442695, %v1432_v41 }
 0xbd3   :  { %2353 = vrot.lane.b32.xlu1 %v2352_v38, %s2466_s0  ;;  %2406 = vpow2.f32 %v1434_v42 }
 0xbd9   :  { %v3261_v24 = vpop.eup %2406 }
 0xbda   :  { %v1602_v44 = vpop.xlane.xlu1 %1601  ;;  %2183 = vmatmul.msk.f32.vlgmr.msrb.gmra.mxu0 %vm389_vm4, %v3261_v24 }
 0xbdb   :  { %v1606_v31 = vsub.f32 %v1562_v12, %v1602_v44  ;;  %2358 = vrot.lane.b32.xlu1 %v2357_v43, %s2466_s0 }
 0xbdd   :  { %v1608_v45 = vmul.f32 1.442695, %v1606_v31 }
 0xbdf   :  { %2408 = vpow2.f32 %v1608_v45 }
 0xbe1   :  { %v1733_v33 = vpop.permute.xlu0 %1732 }
 0xbe2   :  { %2192 = vmatmul.msk.f32.vlgmr.msra.gmra.mxu0 %vm324_vm3, %v1565_v39  ;;  %2202 = vmatmul.msk.f32.vlgmr.msrb.gmra.mxu3 %vm324_vm3, %v1733_v33 }
 0xbe5   :  { %v2409_v15 = vpop.eup %2408 }
 0xbe6   :  { %2193 = vmatmul.msk.f32.vlgmr.msra.gmra.mxu2 %vm389_vm4, %v2409_v15  ;;  %v1612_v14 = vsel %vm389_vm4, %v2409_v15, 0.0 }
 0xbf2   :  { %v1697_v32 = vpop.permute.xlu1 %1696 }
 0xbf3   :  { %2198 = vmatmul.msk.f32.vlgmr.msrb.gmra.mxu2 %vm324_vm3, %v1697_v32 }
 0xc0c   :  { %v1431_v46 = vpop.xlane.xlu0 %1430  ;;  %v2339_v8 = vpop.permute.xlu2 %2338 }
 0xc0d   :  { %v1433_v47 = vsub.f32 %v1424_v21, %v1431_v46  ;;  %v2340_v20 = vunpack.i.l.bf16 %v2339_v8  ;;  %v2341_v22 = vunpack.i.h.bf16 %v2339_v8 }
 0xc0f   :  { %v1436_v48 = vmul.f32 1.442695, %v1433_v47  ;;  %1507 = vmatpush.msra.mxu1 %v2340_v20 }
 0xc11   :  { %2410 = vpow2.f32 %v1436_v48  ;;  %1508 = vmatpush.msra.mxu1 %v2341_v22 }
 0xc17   :  { %v2411_v36 = vpop.eup %2410 }
 0xc18   :  { %v1441_v49 = vsel %vm389_vm4, %v2411_v36, 0.0 }
 0xc19   :  { %1442 = vadd.xlane.f32.xlu1 %v1441_v49 }
 0xc1d   :  { %v1289_v50 = vpop.xlane.xlu1 %1288 }
 0xc1e   :  { %v1291_v51 = vsub.f32 %v1282_v30, %v1289_v50  ;;  %v1438_v30 = vsel %vm389_vm4, %v3261_v24, 0.0 }
 0xc20   :  { %v1294_v52 = vmul.f32 1.442695, %v1291_v51  ;;  %v3276_v62 = vpop.f32.mrf.mxu0 }
 0xc22   :  { %2412 = vpow2.f32 %v1294_v52 }
 0xc24   :  { %v2344_v57 = vpop.permute.xlu0 %2343 }
 0xc25   :  { %v2345_v59 = vunpack.i.l.bf16 %v2344_v57  ;;  %v2346_v3 = vunpack.i.h.bf16 %v2344_v57 }
 0xc28   :  { %v2413_v53 = vpop.eup %2412 }
 0xc29   :  { %2174 = vmatmul.msk.f32.vlgmr.msrb.gmra.mxu1 %vm389_vm4, %v2413_v53  ;;  %v1299_v55 = vsel %vm389_vm4, %v2413_v53, 0.0 }
 0xc2a   :  { %1300 = vadd.xlane.f32.xlu1 %v1299_v55 }
 0xc35   :  { %v1483_v58 = vpop.permute.xlu1 %1482 }
 0xc36   :  { %1509 = vmatpush.msra.mxu1 %v1483_v58 }
 0xc37   :  { %2184 = vmatmul.msk.f32.vlgmr.msra.gmra.mxu1 %vm389_vm4, %v2411_v36 }
 0xc38   :  { %1675 = vmatpush.msrb.mxu1 %v2345_v59 }
 0xc3a   :  { %1676 = vmatpush.msrb.mxu1 %v2346_v3 }
 0xc3d   :  { %v3273_v60 = vpop.permute.xlu1 %2348 }
 0xc3e   :  { %v2350_v4 = vunpack.i.l.bf16 %v3273_v60  ;;  %v2351_v46 = vunpack.i.h.bf16 %v3273_v60 }
 0xc40   :  { %1811 = vmatpush.msrb.mxu0 %v2350_v4 }
 0xc45   :  { %v3280_v23 = vpop.permute.xlu1 %2353 }
 0xc46   :  { %v2355_v1 = vunpack.i.l.bf16 %v3280_v23  ;;  %v2356_v8 = vunpack.i.h.bf16 %v3280_v23 }
 0xc48   :  { %1812 = vmatpush.msrb.mxu0 %v2355_v1 }
 0xc4d   :  { %v3283_v25 = vpop.permute.xlu1 %2358 }
 0xc4e   :  { %v2360_v10 = vunpack.i.l.bf16 %v3283_v25  ;;  %v2361_v20 = vunpack.i.h.bf16 %v3283_v25 }
 0xc50   :  { %1813 = vmatpush.msrb.mxu0 %v2360_v10 }
 0xc57   :  { %v3278_v0 = vpop.f32.mrf.mxu0 }
 0xc5f   :  { %v1597_v2 = vpop.f32.mrf.mxu0 }
 0xc60   :  { %v1598_v5 = vadd.f32 %v1597_v2, %v2893_v61 }
 0xc62   :  { %v1603_v11 = vsel %vm389_vm4, %v1598_v5, -inf }
 0xc63   :  { %1604 = vmax.xlane.f32.xlu2 %v1603_v11  ;;  %v2275_v11 = vld [vmem:[%s3382_s14 + $0x18] sm:$0xff] }
 0xc64   :  { %1893 = vmatpush.bf16.msra.mxu0 %v2275_v11 }
 0xc65   :  { %v1765_v12 = vpop.f32.mrf.mxu3 }
 0xc66   :  { %v1766_v28 = vadd.f32 %v1765_v12, %v2893_v61  ;;  %v2274_v12 = vld [vmem:[%s3382_s14 + $0x10] sm:$0xff] }
 0xc68   :  { %v1771_v34 = vsel %vm389_vm4, %v1766_v28, -inf  ;;  %1894 = vmatpush.bf16.msra.mxu0 %v2274_v12 }
 0xc69   :  { %1772 = vmax.xlane.f32.xlu0 %v1771_v34  ;;  %v1647_v13 = vpop.f32.mrf.mxu2 }
 0xc71   :  { %1613 = vadd.xlane.f32.xlu0 %v1612_v14 }
 0xc76   :  { %v1729_v9 = vpop.f32.mrf.mxu2 }
 0xc77   :  { %v1730_v21 = vadd.f32 %v1729_v9, %v2879_v56  ;;  %v1296_v56 = vsel %vm389_vm4, %v3229_v54, 0.0 }
 0xc79   :  { %v1768_v6 = vsel %vm389_vm4, %v1730_v21, -inf }
 0xc7a   :  { %1769 = vmax.xlane.f32.xlu2 %v1768_v6  ;;  %v2277_v6 = vld [vmem:[%s3384_s16 + $0x18] sm:$0xff] }
 0xc8c   :  { %v1443_v26 = vpop.xlane.xlu1 %1442 }
 0xc92   :  { %1650 = vrot.lane.b32.xlu2 %v3248_v16, %s2465_s22 }
 0xc9d   :  { %v1301_v27 = vpop.xlane.xlu1 %1300 }
 0xc9e   :  { %2414 = vrcp.f32 %v1301_v27 }
 0xc9f   :  { %2416 = vrcp.f32 %v1443_v26  ;;  %v2276_v26 = vld [vmem:[%s3384_s16 + $0x10] sm:$0xff] }
 0xca4   :  { %v2415_v61 = vpop.eup %2414 }
 0xca5   :  { %v2417_v19 = vpop.eup %2416 }
 0xca6   :  { %v1345_v29 = vpop.f32.mrf.mxu1 }
 0xca7   :  { %v1351_v39 = vmul.f32 %v2415_v61, %v1345_v29  ;;  %v2369_v29 = vld [vmem:[%s3383_s15 + $0x1] ss:$0 sm:$0xff] }
 0xca9   :  { %1353 = vst.msk [vmem:[#allocation5 + $0x8] sm:$0xff] %vm324_vm3, %v1351_v39 }
 0xcb4   :  { %v1511_v63 = vpop.f32.mrf.mxu1 }
 0xcb5   :  { %v1517_v35 = vmul.f32 %v2417_v19, %v1511_v63 }
 0xcbb   :  { %1439 = vadd.xlane.f32.xlu2 %v1438_v30 }
 0xcc3   :  { %1297 = vadd.xlane.f32.xlu2 %v1296_v56 }
 0xcd6   :  { %v1605_v38 = vpop.xlane.xlu2 %1604 }
 0xcd7   :  { %v1607_v41 = vsub.f32 %v1598_v5, %v1605_v38 }
 0xcd9   :  { %v1610_v44 = vmul.f32 1.442695, %v1607_v41 }
 0xcdb   :  { %1522 = vrot.lane.b32.xlu2 %v1517_v35, %s2467_s8  ;;  %v2281_v35 = vld [vmem:[%s3386_s18 + $0x38] sm:$0xff] }
 0xcdc   :  { %v1773_v37 = vpop.xlane.xlu0 %1772  ;;  %1993 = vmatpush.bf16.msra.mxu2 %v2281_v35 }
 0xcdd   :  { %v1775_v16 = vsub.f32 %v1766_v28, %v1773_v37  ;;  %v2279_v37 = vld [vmem:[%s3386_s18 + $0x28] sm:$0xff] }
 0xcdf   :  { %v1778_v7 = vmul.f32 1.442695, %v1775_v16 }
 0xce1   :  { %2418 = vpow2.f32 %v1778_v7  ;;  %v2370_v7 = vld [vmem:[%s3385_s17 + $0x1] ss:$0 sm:$0xff]  ;;  %s3421_s17 = sld [smem:[#allocation19_spill]] }
 0xce4   :  { %v1614_v40 = vpop.xlane.xlu0 %1613 }
 0xce5   :  { %2420 = vrcp.f32 %v1614_v40 }
 0xce6   :  { %2422 = vpow2.f32 %v1610_v44 }
 0xce7   :  { %v2419_v42 = vpop.eup %2418  ;;  %s2020_s24 = sshll.u32 %s3421_s17, 4  ;;  %s2021_s24 = int_to_ptr.hbm [resolvable:$true] %s2020_s24 }
 0xce8   :  { %v1783_v43 = vsel %vm389_vm4, %v2419_v42, 0.0 }
 0xce9   :  { %1784 = vadd.xlane.f32.xlu0 %v1783_v43 }
 0xceb   :  { %v2421_v31 = vpop.eup %2420 }
 0xcec   :  { %v1684_v45 = vmul.f32 %v2421_v31, %v1647_v13  ;;  %v2423_v32 = vpop.eup %2422 }
 0xced   :  { %v1770_v54 = vpop.xlane.xlu2 %1769  ;;  %v1615_v53 = vsel %vm389_vm4, %v2423_v32, 0.0 }
 0xcee   :  { %v1774_v24 = vsub.f32 %v1730_v21, %v1770_v54  ;;  %1688 = vrot.lane.b32.xlu1 %v1684_v45, %s2469_s4  ;;  %v2371_v54 = vld [vmem:[%s3387_s19 + $0x1] ss:$0 sm:$0xff] }
 0xcf0   :  { %v1776_v33 = vmul.f32 1.442695, %v1774_v24 }
 0xcf2   :  { %2424 = vpow2.f32 %v1776_v33 }
 0xcf5   :  { %v1651_v15 = vpop.permute.xlu2 %1650 }
 0xcf6   :  { %1677 = vmatpush.msrb.mxu1 %v1651_v15 }
 0xcf7   :  { %2194 = vmatmul.msk.f32.vlgmr.msrb.gmra.mxu1 %vm389_vm4, %v2423_v32 }
 0xcf8   :  { %v2425_v47 = vpop.eup %2424  ;;  %1843 = vmatpush.msra.mxu1 %v2351_v46 }
 0xcf9   :  { %2203 = vmatmul.msk.f32.vlgmr.msrb.gmra.mxu0 %vm389_vm4, %v2425_v47  ;;  %v1780_v55 = vsel %vm389_vm4, %v2425_v47, 0.0 }
 0xcfa   :  { %1844 = vmatpush.msra.mxu1 %v2356_v8 }
 0xcfc   :  { %1845 = vmatpush.msra.mxu1 %v2361_v20 }
 0xcfe   :  { %1942 = vmatpush.bf16.msrb.mxu1 %v2277_v6 }
 0xcff   :  { %2204 = vmatmul.msk.f32.vlgmr.msra.gmra.mxu1 %vm389_vm4, %v2419_v42 }
 0xd02   :  { %1943 = vmatpush.bf16.msrb.mxu1 %v2276_v26 }
 0xd2e   :  { %v1440_v48 = vpop.xlane.xlu2 %1439 }
 0xd2f   :  { %2426 = vrcp.f32 %v1440_v48 }
 0xd35   :  { %v2427_v22 = vpop.eup %2426 }
 0xd36   :  { %v1298_v36 = vpop.xlane.xlu2 %1297  ;;  %v1516_v49 = vmul.f32 %v2427_v22, %v3278_v0 }
 0xd37   :  { %2428 = vrcp.f32 %v1298_v36 }
 0xd38   :  { %1520 = vrot.lane.b32.xlu0 %v1516_v49, %s2467_s8 }
 0xd3d   :  { %v2429_v50 = vpop.eup %2428 }
 0xd3e   :  { %v1350_v51 = vmul.f32 %v2429_v50, %v3276_v62  ;;  %v1523_v52 = vpop.permute.xlu2 %1522 }
 0xd3f   :  { %1527 = vst.msk [vmem:[#allocation5 + $0x8] sm:$0xff] %vm632_vm5, %v1523_v52 }
 0xd40   :  { %1352 = vst.msk [vmem:[#allocation5] sm:$0xff] %vm324_vm3, %v1350_v51 }
 0xd5c   :  { %v1785_v57 = vpop.xlane.xlu0 %1784 }
 0xd60   :  { %v1689_v59 = vpop.permute.xlu1 %1688 }
 0xd62   :  { %1616 = vadd.xlane.f32.xlu0 %v1615_v53 }
 0xd6a   :  { %1781 = vadd.xlane.f32.xlu0 %v1780_v55 }
 0xd74   :  { %v1679_v60 = vpop.f32.mrf.mxu1 }
 0xd76   :  { %v1815_v25 = vpop.f32.mrf.mxu0 }
 0xd7c   :  { %v1847_v23 = vpop.f32.mrf.mxu1 }
 0xdaa   :  { %v1521_v58 = vpop.permute.xlu0 %1520 }
 0xdab   :  { %1526 = vst.msk [vmem:[#allocation5] sm:$0xff] %vm632_vm5, %v1521_v58 }
 0xdac   :  { %1694 = vst.msk [vmem:[#allocation5] sm:$0xff] %vm801_vm6, %v1689_v59 }
 0xdd5   :  { %v1617_v3 = vpop.xlane.xlu0 %1616 }
 0xdd6   :  { %2430 = vrcp.f32 %v1617_v3 }
 0xdd7   :  { %2432 = vrcp.f32 %v1785_v57 }
 0xddc   :  { %v2431_v4 = vpop.eup %2430 }
 0xddd   :  { %v1782_v62 = vpop.xlane.xlu0 %1781  ;;  %v1685_v0 = vmul.f32 %v2431_v4, %v1679_v60  ;;  %v2433_v1 = vpop.eup %2432 }
 0xdde   :  { %2434 = vrcp.f32 %v1782_v62  ;;  %v1853_v5 = vmul.f32 %v2433_v1, %v1847_v23 }
 0xddf   :  { %1690 = vrot.lane.b32.xlu0 %v1685_v0, %s2469_s4 }
 0xde4   :  { %v2435_v2 = vpop.eup %2434 }
 0xde5   :  { %v1852_v10 = vmul.f32 %v2435_v2, %v1815_v25 }
 0xde7   :  { %1858 = vrot.lane.b32.xlu0 %v1853_v5, %s2468_s27  ;;  %1856 = vrot.lane.b32.xlu2 %v1852_v10, %s2468_s27 }
 0xe41   :  { %v1857_v28 = vpop.permute.xlu2 %1856 }
 0xe42   :  { %1862 = vst.msk [vmem:[#allocation5] sm:$0xff] %vm970_vm7, %v1857_v28 }
 0xe49   :  { %v1864_v14 = vld [vmem:[#allocation5] sm:$0xff] }
 0xe51   :  { %v1691_v34 = vpop.permute.xlu0 %1690 }
 0xe52   :  { %1695 = vst.msk [vmem:[#allocation5 + $0x8] sm:$0xff] %vm801_vm6, %v1691_v34 }
 0xe59   :  { %v1859_v13 = vpop.permute.xlu0 %1858 }
 0xe5a   :  { %1863 = vst.msk [vmem:[#allocation5 + $0x8] sm:$0xff] %vm970_vm7, %v1859_v13 }
 0xe61   :  { %v1865_v9 = vld [vmem:[#allocation5 + $0x8] sm:$0xff] }
 0xe62   :  { %v1866_v21 = vpack.c.bf16 %v1865_v9, %v1864_v14 }
 0xe64   :  { %2217 = vmatmul.msk.bf16.vlgmr.msra.gmra.mxu0 %vm122_vm2, %v1866_v21 }
 0xee1   :  { %v1896_v27 = vpop.f32.mrf.mxu0 }
 0xee2   :  { %v1901_v61 = vadd.f32 %v1896_v27, %v3095_v17  ;;  %v2280_v17 = vld [vmem:[%s3386_s18 + $0x30] sm:$0xff] }
 0xee3   :  { %1994 = vmatpush.bf16.msra.mxu2 %v2280_v17 }
 0xee4   :  { %v1908_v56 = vadd.f32 %v2369_v29, %v1901_v61 }
 0xee7   :  { %1995 = vmatpush.bf16.msra.mxu2 %v2279_v37 }
 0xee9   :  { %v1898_v39 = vpop.f32.mrf.mxu0 }
 0xeea   :  { %v1902_v30 = vadd.f32 %v1898_v39, %v3097_v18  ;;  %v2278_v18 = vld [vmem:[%s3386_s18 + $0x20] sm:$0xff] }
 0xeeb   :  { %1996 = vmatpush.bf16.msra.mxu2 %v2278_v18 }
 0xeec   :  { %v1909_v63 = vadd.f32 %v2369_v29, %v1902_v30 }
 0xeee   :  { %v1910_v19 = vpack.c.bf16 %v1909_v63, %v1908_v56 }
 0xef0   :  { %2232 = vmatmul.msk.bf16.vlgmr.msrb.gmra.mxu1 %vm122_vm2, %v1910_v19 }
 0xf6d   :  { %v1945_v16 = vpop.f32.mrf.mxu1 }
 0xf6e   :  { %v1946_v38 = vadd.f32 %v2370_v7, %v1945_v16 }
 0xf70   :  { %v1950_v42 = vmax.f32 %v1946_v38, 0.0 }
 0xf75   :  { %v1947_v40 = vpop.f32.mrf.mxu1 }
 0xf76   :  { %v1948_v41 = vadd.f32 %v2370_v7, %v1947_v40 }
 0xf78   :  { %v1951_v43 = vmax.f32 %v1948_v41, 0.0 }
 0xf7a   :  { %v1952_v44 = vpack.c.bf16 %v1951_v43, %v1950_v42 }
 0xf7c   :  { %2257 = vmatmul.msk.bf16.vlgmr.msra.gmra.mxu2 %vm1090_vm8, %v1952_v44 }
 0xfff   :  { %v1998_v31 = vpop.f32.mrf.mxu2 }
0x1000   :  { %v2003_v24 = vadd.f32 %v1998_v31, %v1908_v56 }
0x1002   :  { %v2010_v45 = vadd.f32 %v2371_v54, %v2003_v24 }
0x1004   :  { %2012 = vst.msk [vmem:[#allocation6] sm:$0xff] %vm122_vm2, %v2010_v45 }
0x1007   :  { %v2000_v33 = vpop.f32.mrf.mxu2 }
0x1008   :  { %v2004_v15 = vadd.f32 %v2000_v33, %v1909_v63 }
0x100a   :  { %v2011_v32 = vadd.f32 %v2371_v54, %v2004_v15 }
0x100c   :  { %2013 = vst.msk [vmem:[#allocation6 + $0x8] sm:$0xff] %vm122_vm2, %v2011_v32 }
0x100d   :  { %2026 = dma.vmem_to_hbm [thread:$0]  %s2019_s6, 256, %s2021_s24, [#allocation7], %s2471_s10, %s2471_s10, %s2467_s8  }
0x100e   :  { %2460 = dma.done.wait [#allocation7], 256  }
0x100f   :  { %2461 = vsyncadd [#allocation7], 4294967040 }
0x1010   :  { %2051 = vsyncpa [#allocation7], 1 }

</bundles_post_ra>
